<compile_context>
chip_gen: v5e
topology: v5e:2x2
jax: 0.10.0
libtpu: 0.0.40
codegen_flags: <defaults>
</compile_context>

<pallas_src>
import jax
import jax.numpy as jnp
from jax import lax
from jax.experimental import pallas as pl
from jax.experimental.pallas import tpu as pltpu

# ----- "config" (synthetic, deterministic) -----
VOCAB = 14          # len(config.num_seq)
EMB = 16            # config.embedding_dim
HID = 32            # config.hidden_size
NUM_LAYER = 1       # config.num_layer (kernel implements the 1-layer case)
MAX_LEN = 8         # config.max_len
SOS = 2             # config.num_seq.SOS
PAD = 0             # config.num_seq.PAD


def decoder_kernel(t_ref,            # [VOCAB, 3*HID]  emb @ W_i^T + b_i, gates (r|z|n)
                   w_h_ref,          # [HID, 3*HID]    (W_hr^T | W_hz^T | W_hn^T)
                   b_h_ref,          # [1, 3*HID]      (b_hr | b_hz | b_hn)
                   fc_w_ref,         # [HID, VOCAB]
                   fc_b_ref,         # [1, VOCAB]
                   h0_ref,           # [B, HID]        (aliased with hfin_ref)
                   out_ref,          # [MAX_LEN+1, B, VOCAB]  (output)
                   hfin_ref):        # [B, HID]               (output, aliases h0)
    B = h0_ref.shape[0]
    V = fc_b_ref.shape[1]
    H = h0_ref.shape[1]

    # Only the last time slot is never written by the loop -> zero just that one.
    out_ref[MAX_LEN, :, :] = jnp.zeros((B, V), jnp.float32)

    # Hoisted constants / weight loads (live in vregs across the unrolled loop).
    lane = lax.broadcasted_iota(jnp.int32, (B, V), 1)
    t_tab = t_ref[...]
    w_h = w_h_ref[...]
    b_h = b_h_ref[...]
    fc_w = fc_w_ref[...]
    fc_b = fc_b_ref[...]

    # Recurrent state carried in vregs: hidden state + one-hot of current decoder input (SOS).
    h = h0_ref[...]
    onehot = (lane == SOS).astype(jnp.float32)

    # Fully unrolled static loop (8 steps): static output indices, full scheduler visibility.
    for t in range(MAX_LEN):
        # Input-side gates: embedding lookup + W_i projection + b_i folded into one table.
        gi = jnp.dot(onehot, t_tab, preferred_element_type=jnp.float32)        # [B, 3H]
        # Hidden-side gates: single fused matmul.
        gh = jnp.dot(h, w_h, preferred_element_type=jnp.float32) + b_h         # [B, 3H]

        r = jax.nn.sigmoid(gi[:, :H] + gh[:, :H])
        z = jax.nn.sigmoid(gi[:, H:2 * H] + gh[:, H:2 * H])
        n = jnp.tanh(gi[:, 2 * H:] + r * gh[:, 2 * H:])
        h = (1.0 - z) * n + z * h                                              # [B, H]

        # fc + log_softmax (numerically stable)
        logits = jnp.dot(h, fc_w, preferred_element_type=jnp.float32) + fc_b   # [B, V]
        m = jnp.max(logits, axis=-1, keepdims=True)
        shifted = logits - m                                                   # max(shifted) == 0
        logp = shifted - jnp.log(jnp.sum(jnp.exp(shifted), axis=-1, keepdims=True))

        out_ref[t, :, :] = logp

        # Greedy next input: argmax(logp) == argmax(shifted); reuse shifted (>= 0 marks maxima),
        # first occurrence on ties via min lane index.
        idx = jnp.min(jnp.where(shifted >= 0.0, lane, V), axis=-1, keepdims=True)  # [B, 1]
        onehot = (lane == idx).astype(jnp.float32)

    hfin_ref[...] = h


def make_params(key):
    ks = jax.random.split(key, 7)
    emb = 0.1 * jax.random.normal(ks[0], (VOCAB, EMB), jnp.float32)
    emb = emb.at[PAD].set(0.0)  # padding_idx row is zero
    w_i = 0.1 * jax.random.normal(ks[1], (3, EMB, HID), jnp.float32)   # gates (r, z, n), input-major
    w_h = 0.1 * jax.random.normal(ks[2], (3, HID, HID), jnp.float32)
    b_i = 0.1 * jax.random.normal(ks[3], (3, 1, HID), jnp.float32)
    b_h = 0.1 * jax.random.normal(ks[4], (3, 1, HID), jnp.float32)
    fc_w = 0.1 * jax.random.normal(ks[5], (HID, VOCAB), jnp.float32)
    fc_b = 0.1 * jax.random.normal(ks[6], (1, VOCAB), jnp.float32)
    return dict(emb=emb, w_i=w_i, w_h=w_h, b_i=b_i, b_h=b_h, fc_w=fc_w, fc_b=fc_b)


@jax.jit
def decoder_forward(params, target, encoder_hidden):
    # target: [B, L] int (only batch size is used, matching the PyTorch forward)
    # encoder_hidden: [NUM_LAYER, B, HID]
    B = target.shape[0]
    h0 = encoder_hidden[0].astype(jnp.float32)  # [B, HID]   (NUM_LAYER == 1)

    # ---- host-side (plain JAX) pre-baking of fused tables ----
    emb, w_i, b_i = params["emb"], params["w_i"], params["b_i"]
    # Fold embedding + input-gate weights + input biases: exact because one-hot rows sum to 1.
    t_tab = jnp.concatenate(
        [emb @ w_i[g] + b_i[g] for g in range(3)], axis=-1)          # [VOCAB, 3*HID]
    w_h_all = jnp.concatenate([params["w_h"][g] for g in range(3)], axis=-1)   # [HID, 3*HID]
    b_h_all = jnp.concatenate([params["b_h"][g] for g in range(3)], axis=-1)   # [1, 3*HID]

    vmem = pl.BlockSpec(memory_space=pltpu.MemorySpace.VMEM)
    outs_tbv, hfin = pl.pallas_call(
        decoder_kernel,
        out_shape=(jax.ShapeDtypeStruct((MAX_LEN + 1, B, VOCAB), jnp.float32),
                   jax.ShapeDtypeStruct((B, HID), jnp.float32)),
        in_specs=[vmem] * 6,
        out_specs=(vmem, vmem),
        input_output_aliases={5: 1},   # h0 buffer reused as the final-hidden output
    )(t_tab, w_h_all, b_h_all, params["fc_w"], params["fc_b"], h0)

    decoder_outputs = jnp.transpose(outs_tbv, (1, 0, 2))   # [B, MAX_LEN+1, VOCAB]
    decoder_hidden = hfin[None, :, :]                      # [NUM_LAYER, B, HID]
    return decoder_outputs, decoder_hidden


if __name__ == "__main__":
    key = jax.random.PRNGKey(0)
    kp, kt, kh = jax.random.split(key, 3)

    params = make_params(kp)
    B = 2
    target = jax.random.randint(kt, (B, MAX_LEN), 0, VOCAB, dtype=jnp.int32)   # content unused, as in PyTorch
    encoder_hidden = jax.random.normal(kh, (NUM_LAYER, B, HID), jnp.float32)

    decoder_outputs, decoder_hidden = decoder_forward(params, target, encoder_hidden)
    jax.block_until_ready((decoder_outputs, decoder_hidden))

    # sanity checks: shapes, finiteness, and that each written step is a valid log-softmax row
    assert decoder_outputs.shape == (B, MAX_LEN + 1, VOCAB)
    assert decoder_hidden.shape == (NUM_LAYER, B, HID)
    assert bool(jnp.all(jnp.isfinite(decoder_outputs)))
    assert bool(jnp.all(jnp.isfinite(decoder_hidden)))
    probs_sum = jnp.sum(jnp.exp(decoder_outputs[:, :MAX_LEN, :]), axis=-1)
    assert bool(jnp.all(jnp.abs(probs_sum - 1.0) < 1e-3))
    # last time slot stays zero, matching torch.zeros([B, max_len+1, V]) with only t < max_len written
    assert bool(jnp.all(decoder_outputs[:, MAX_LEN, :] == 0.0))

    print("KERNEL_OK")
</pallas_src>

<mosaic_0001>
module attributes {stable_mosaic.version = 11 : i64} {
  func.func @decoder_kernel(%arg0: memref<14x96xf32, #tpu.memory_space<vmem>>, %arg1: memref<32x96xf32, #tpu.memory_space<vmem>>, %arg2: memref<1x96xf32, #tpu.memory_space<vmem>>, %arg3: memref<32x14xf32, #tpu.memory_space<vmem>>, %arg4: memref<1x14xf32, #tpu.memory_space<vmem>>, %arg5: memref<2x32xf32, #tpu.memory_space<vmem>>, %arg6: memref<9x2x14xf32, #tpu.memory_space<vmem>>, %arg7: memref<2x32xf32, #tpu.memory_space<vmem>>) attributes {dimension_semantics = [], scalar_prefetch = 0 : i64, scratch_operands = 0 : i64, tpu.core_type = #tpu.core_type<tc>} {
    %cst = arith.constant 0.000000e+00 : f32
    %0 = vector.broadcast %cst : f32 to vector<2x14xf32>
    %c8 = arith.constant 8 : index
    %c0 = arith.constant 0 : index
    %c0_0 = arith.constant 0 : index
    %1 = vector.load %arg6[%c8, %c0, %c0_0] : memref<9x2x14xf32, #tpu.memory_space<vmem>>, vector<1x2x14xf32>
    %2 = vector.shape_cast %1 : vector<1x2x14xf32> to vector<2x14xf32>
    %3 = vector.shape_cast %0 : vector<2x14xf32> to vector<1x2x14xf32>
    tpu.vector_store %arg6[%c8, %c0, %c0_0], %3 {strides = array<i32>} : memref<9x2x14xf32, #tpu.memory_space<vmem>>, vector<1x2x14xf32>,
    %4 = tpu.iota {dimensions = array<i32: 1>} : vector<2x14xi32>
    %c0_1 = arith.constant 0 : index
    %c0_2 = arith.constant 0 : index
    %5 = vector.load %arg0[%c0_1, %c0_2] : memref<14x96xf32, #tpu.memory_space<vmem>>, vector<14x96xf32>
    %c0_3 = arith.constant 0 : index
    %c0_4 = arith.constant 0 : index
    %6 = vector.load %arg1[%c0_3, %c0_4] : memref<32x96xf32, #tpu.memory_space<vmem>>, vector<32x96xf32>
    %c0_5 = arith.constant 0 : index
    %c0_6 = arith.constant 0 : index
    %7 = vector.load %arg2[%c0_5, %c0_6] : memref<1x96xf32, #tpu.memory_space<vmem>>, vector<1x96xf32>
    %c0_7 = arith.constant 0 : index
    %c0_8 = arith.constant 0 : index
    %8 = vector.load %arg3[%c0_7, %c0_8] : memref<32x14xf32, #tpu.memory_space<vmem>>, vector<32x14xf32>
    %c0_9 = arith.constant 0 : index
    %c0_10 = arith.constant 0 : index
    %9 = vector.load %arg4[%c0_9, %c0_10] : memref<1x14xf32, #tpu.memory_space<vmem>>, vector<1x14xf32>
    %c0_11 = arith.constant 0 : index
    %c0_12 = arith.constant 0 : index
    %10 = vector.load %arg5[%c0_11, %c0_12] : memref<2x32xf32, #tpu.memory_space<vmem>>, vector<2x32xf32>
    %c2_i32 = arith.constant 2 : i32
    %11 = vector.broadcast %c2_i32 : i32 to vector<2x14xi32>
    %12 = arith.cmpi eq, %4, %11 : vector<2x14xi32>
    %13 = arith.extui %12 : vector<2x14xi1> to vector<2x14xi32>
    %14 = arith.sitofp %13 : vector<2x14xi32> to vector<2x14xf32>
    %cst_13 = arith.constant dense<0.000000e+00> : vector<2x96xf32>
    %15 = tpu.matmul %14, %5, %cst_13 {dimension_numbers = #tpu.dot_dimension_numbers<[1], [0], [0], [1], [0, 0, 1, 1], [], []>} : vector<2x14xf32>, vector<14x96xf32>, vector<2x96xf32> -> vector<2x96xf32>
    %cst_14 = arith.constant dense<0.000000e+00> : vector<2x96xf32>
    %16 = tpu.matmul %10, %6, %cst_14 {dimension_numbers = #tpu.dot_dimension_numbers<[1], [0], [0], [1], [0, 0, 1, 1], [], []>} : vector<2x32xf32>, vector<32x96xf32>, vector<2x96xf32> -> vector<2x96xf32>
    %17 = vector.broadcast %7 : vector<1x96xf32> to vector<2x96xf32>
    %18 = arith.addf %16, %17 : vector<2x96xf32>
    %19 = vector.extract_strided_slice %15 {offsets = [0, 0], sizes = [2, 32], strides = [1, 1]} : vector<2x96xf32> to vector<2x32xf32>
    %20 = vector.extract_strided_slice %18 {offsets = [0, 0], sizes = [2, 32], strides = [1, 1]} : vector<2x96xf32> to vector<2x32xf32>
    %21 = arith.addf %19, %20 : vector<2x32xf32>
    %22 = arith.negf %21 : vector<2x32xf32>
    %23 = math.exp %22 : vector<2x32xf32>
    %cst_15 = arith.constant 1.000000e+00 : f32
    %24 = vector.broadcast %cst_15 : f32 to vector<2x32xf32>
    %25 = arith.addf %24, %23 : vector<2x32xf32>
    %26 = arith.divf %24, %25 : vector<2x32xf32>
    %27 = vector.extract_strided_slice %15 {offsets = [0, 32], sizes = [2, 32], strides = [1, 1]} : vector<2x96xf32> to vector<2x32xf32>
    %28 = vector.extract_strided_slice %18 {offsets = [0, 32], sizes = [2, 32], strides = [1, 1]} : vector<2x96xf32> to vector<2x32xf32>
    %29 = arith.addf %27, %28 : vector<2x32xf32>
    %30 = arith.negf %29 : vector<2x32xf32>
    %31 = math.exp %30 : vector<2x32xf32>
    %cst_16 = arith.constant 1.000000e+00 : f32
    %32 = vector.broadcast %cst_16 : f32 to vector<2x32xf32>
    %33 = arith.addf %32, %31 : vector<2x32xf32>
    %34 = arith.divf %32, %33 : vector<2x32xf32>
    %35 = vector.extract_strided_slice %15 {offsets = [0, 64], sizes = [2, 32], strides = [1, 1]} : vector<2x96xf32> to vector<2x32xf32>
    %36 = vector.extract_strided_slice %18 {offsets = [0, 64], sizes = [2, 32], strides = [1, 1]} : vector<2x96xf32> to vector<2x32xf32>
    %37 = arith.mulf %26, %36 : vector<2x32xf32>
    %38 = arith.addf %35, %37 : vector<2x32xf32>
    %39 = math.tanh %38 : vector<2x32xf32>
    %cst_17 = arith.constant 1.000000e+00 : f32
    %40 = vector.broadcast %cst_17 : f32 to vector<2x32xf32>
    %41 = arith.subf %40, %34 : vector<2x32xf32>
    %42 = arith.mulf %41, %39 : vector<2x32xf32>
    %43 = arith.mulf %34, %10 : vector<2x32xf32>
    %44 = arith.addf %42, %43 : vector<2x32xf32>
    %cst_18 = arith.constant dense<0.000000e+00> : vector<2x14xf32>
    %45 = tpu.matmul %44, %8, %cst_18 {dimension_numbers = #tpu.dot_dimension_numbers<[1], [0], [0], [1], [0, 0, 1, 1], [], []>} : vector<2x32xf32>, vector<32x14xf32>, vector<2x14xf32> -> vector<2x14xf32>
    %46 = vector.broadcast %9 : vector<1x14xf32> to vector<2x14xf32>
    %47 = arith.addf %45, %46 : vector<2x14xf32>
    %cst_19 = arith.constant dense<0xFF800000> : vector<2xf32>
    %48 = vector.multi_reduction <maximumf>, %47, %cst_19 [1] : vector<2x14xf32> to vector<2xf32>
    %49 = vector.shape_cast %48 : vector<2xf32> to vector<2x1xf32>
    %50 = vector.broadcast %49 : vector<2x1xf32> to vector<2x14xf32>
    %51 = arith.subf %47, %50 : vector<2x14xf32>
    %52 = math.exp %51 : vector<2x14xf32>
    %cst_20 = arith.constant dense<0.000000e+00> : vector<2xf32>
    %53 = vector.multi_reduction <add>, %52, %cst_20 [1] : vector<2x14xf32> to vector<2xf32>
    %54 = vector.shape_cast %53 : vector<2xf32> to vector<2x1xf32>
    %55 = math.log %54 : vector<2x1xf32>
    %56 = vector.broadcast %55 : vector<2x1xf32> to vector<2x14xf32>
    %57 = arith.subf %51, %56 : vector<2x14xf32>
    %c0_21 = arith.constant 0 : index
    %c0_22 = arith.constant 0 : index
    %c0_23 = arith.constant 0 : index
    %58 = vector.load %arg6[%c0_21, %c0_22, %c0_23] : memref<9x2x14xf32, #tpu.memory_space<vmem>>, vector<1x2x14xf32>
    %59 = vector.shape_cast %58 : vector<1x2x14xf32> to vector<2x14xf32>
    %60 = vector.shape_cast %57 : vector<2x14xf32> to vector<1x2x14xf32>
    tpu.vector_store %arg6[%c0_21, %c0_22, %c0_23], %60 {strides = array<i32>} : memref<9x2x14xf32, #tpu.memory_space<vmem>>, vector<1x2x14xf32>,
    %cst_24 = arith.constant 0.000000e+00 : f32
    %61 = vector.broadcast %cst_24 : f32 to vector<2x14xf32>
    %62 = arith.cmpf oge, %51, %61 : vector<2x14xf32>
    %c14_i32 = arith.constant 14 : i32
    %63 = vector.broadcast %c14_i32 : i32 to vector<2x14xi32>
    %64 = arith.select %62, %4, %63 : vector<2x14xi1>, vector<2x14xi32>
    %cst_25 = arith.constant dense<2147483647> : vector<2xi32>
    %65 = vector.multi_reduction <minsi>, %64, %cst_25 [1] : vector<2x14xi32> to vector<2xi32>
    %66 = vector.shape_cast %65 : vector<2xi32> to vector<2x1xi32>
    %67 = vector.broadcast %66 : vector<2x1xi32> to vector<2x14xi32>
    %68 = arith.cmpi eq, %4, %67 : vector<2x14xi32>
    %69 = arith.extui %68 : vector<2x14xi1> to vector<2x14xi32>
    %70 = arith.sitofp %69 : vector<2x14xi32> to vector<2x14xf32>
    %cst_26 = arith.constant dense<0.000000e+00> : vector<2x96xf32>
    %71 = tpu.matmul %70, %5, %cst_26 {dimension_numbers = #tpu.dot_dimension_numbers<[1], [0], [0], [1], [0, 0, 1, 1], [], []>} : vector<2x14xf32>, vector<14x96xf32>, vector<2x96xf32> -> vector<2x96xf32>
    %cst_27 = arith.constant dense<0.000000e+00> : vector<2x96xf32>
    %72 = tpu.matmul %44, %6, %cst_27 {dimension_numbers = #tpu.dot_dimension_numbers<[1], [0], [0], [1], [0, 0, 1, 1], [], []>} : vector<2x32xf32>, vector<32x96xf32>, vector<2x96xf32> -> vector<2x96xf32>
    %73 = vector.broadcast %7 : vector<1x96xf32> to vector<2x96xf32>
    %74 = arith.addf %72, %73 : vector<2x96xf32>
    %75 = vector.extract_strided_slice %71 {offsets = [0, 0], sizes = [2, 32], strides = [1, 1]} : vector<2x96xf32> to vector<2x32xf32>
    %76 = vector.extract_strided_slice %74 {offsets = [0, 0], sizes = [2, 32], strides = [1, 1]} : vector<2x96xf32> to vector<2x32xf32>
    %77 = arith.addf %75, %76 : vector<2x32xf32>
    %78 = arith.negf %77 : vector<2x32xf32>
    %79 = math.exp %78 : vector<2x32xf32>
    %cst_28 = arith.constant 1.000000e+00 : f32
    %80 = vector.broadcast %cst_28 : f32 to vector<2x32xf32>
    %81 = arith.addf %80, %79 : vector<2x32xf32>
    %82 = arith.divf %80, %81 : vector<2x32xf32>
    %83 = vector.extract_strided_slice %71 {offsets = [0, 32], sizes = [2, 32], strides = [1, 1]} : vector<2x96xf32> to vector<2x32xf32>
    %84 = vector.extract_strided_slice %74 {offsets = [0, 32], sizes = [2, 32], strides = [1, 1]} : vector<2x96xf32> to vector<2x32xf32>
    %85 = arith.addf %83, %84 : vector<2x32xf32>
    %86 = arith.negf %85 : vector<2x32xf32>
    %87 = math.exp %86 : vector<2x32xf32>
    %cst_29 = arith.constant 1.000000e+00 : f32
    %88 = vector.broadcast %cst_29 : f32 to vector<2x32xf32>
    %89 = arith.addf %88, %87 : vector<2x32xf32>
    %90 = arith.divf %88, %89 : vector<2x32xf32>
    %91 = vector.extract_strided_slice %71 {offsets = [0, 64], sizes = [2, 32], strides = [1, 1]} : vector<2x96xf32> to vector<2x32xf32>
    %92 = vector.extract_strided_slice %74 {offsets = [0, 64], sizes = [2, 32], strides = [1, 1]} : vector<2x96xf32> to vector<2x32xf32>
    %93 = arith.mulf %82, %92 : vector<2x32xf32>
    %94 = arith.addf %91, %93 : vector<2x32xf32>
    %95 = math.tanh %94 : vector<2x32xf32>
    %cst_30 = arith.constant 1.000000e+00 : f32
    %96 = vector.broadcast %cst_30 : f32 to vector<2x32xf32>
    %97 = arith.subf %96, %90 : vector<2x32xf32>
    %98 = arith.mulf %97, %95 : vector<2x32xf32>
    %99 = arith.mulf %90, %44 : vector<2x32xf32>
    %100 = arith.addf %98, %99 : vector<2x32xf32>
    %cst_31 = arith.constant dense<0.000000e+00> : vector<2x14xf32>
    %101 = tpu.matmul %100, %8, %cst_31 {dimension_numbers = #tpu.dot_dimension_numbers<[1], [0], [0], [1], [0, 0, 1, 1], [], []>} : vector<2x32xf32>, vector<32x14xf32>, vector<2x14xf32> -> vector<2x14xf32>
    %102 = vector.broadcast %9 : vector<1x14xf32> to vector<2x14xf32>
    %103 = arith.addf %101, %102 : vector<2x14xf32>
    %cst_32 = arith.constant dense<0xFF800000> : vector<2xf32>
    %104 = vector.multi_reduction <maximumf>, %103, %cst_32 [1] : vector<2x14xf32> to vector<2xf32>
    %105 = vector.shape_cast %104 : vector<2xf32> to vector<2x1xf32>
    %106 = vector.broadcast %105 : vector<2x1xf32> to vector<2x14xf32>
    %107 = arith.subf %103, %106 : vector<2x14xf32>
    %108 = math.exp %107 : vector<2x14xf32>
    %cst_33 = arith.constant dense<0.000000e+00> : vector<2xf32>
    %109 = vector.multi_reduction <add>, %108, %cst_33 [1] : vector<2x14xf32> to vector<2xf32>
    %110 = vector.shape_cast %109 : vector<2xf32> to vector<2x1xf32>
    %111 = math.log %110 : vector<2x1xf32>
    %112 = vector.broadcast %111 : vector<2x1xf32> to vector<2x14xf32>
    %113 = arith.subf %107, %112 : vector<2x14xf32>
    %c1 = arith.constant 1 : index
    %c0_34 = arith.constant 0 : index
    %c0_35 = arith.constant 0 : index
    %114 = vector.load %arg6[%c1, %c0_34, %c0_35] : memref<9x2x14xf32, #tpu.memory_space<vmem>>, vector<1x2x14xf32>
    %115 = vector.shape_cast %114 : vector<1x2x14xf32> to vector<2x14xf32>
    %116 = vector.shape_cast %113 : vector<2x14xf32> to vector<1x2x14xf32>
    tpu.vector_store %arg6[%c1, %c0_34, %c0_35], %116 {strides = array<i32>} : memref<9x2x14xf32, #tpu.memory_space<vmem>>, vector<1x2x14xf32>,
    %cst_36 = arith.constant 0.000000e+00 : f32
    %117 = vector.broadcast %cst_36 : f32 to vector<2x14xf32>
    %118 = arith.cmpf oge, %107, %117 : vector<2x14xf32>
    %c14_i32_37 = arith.constant 14 : i32
    %119 = vector.broadcast %c14_i32_37 : i32 to vector<2x14xi32>
    %120 = arith.select %118, %4, %119 : vector<2x14xi1>, vector<2x14xi32>
    %cst_38 = arith.constant dense<2147483647> : vector<2xi32>
    %121 = vector.multi_reduction <minsi>, %120, %cst_38 [1] : vector<2x14xi32> to vector<2xi32>
    %122 = vector.shape_cast %121 : vector<2xi32> to vector<2x1xi32>
    %123 = vector.broadcast %122 : vector<2x1xi32> to vector<2x14xi32>
    %124 = arith.cmpi eq, %4, %123 : vector<2x14xi32>
    %125 = arith.extui %124 : vector<2x14xi1> to vector<2x14xi32>
    %126 = arith.sitofp %125 : vector<2x14xi32> to vector<2x14xf32>
    %cst_39 = arith.constant dense<0.000000e+00> : vector<2x96xf32>
    %127 = tpu.matmul %126, %5, %cst_39 {dimension_numbers = #tpu.dot_dimension_numbers<[1], [0], [0], [1], [0, 0, 1, 1], [], []>} : vector<2x14xf32>, vector<14x96xf32>, vector<2x96xf32> -> vector<2x96xf32>
    %cst_40 = arith.constant dense<0.000000e+00> : vector<2x96xf32>
    %128 = tpu.matmul %100, %6, %cst_40 {dimension_numbers = #tpu.dot_dimension_numbers<[1], [0], [0], [1], [0, 0, 1, 1], [], []>} : vector<2x32xf32>, vector<32x96xf32>, vector<2x96xf32> -> vector<2x96xf32>
    %129 = vector.broadcast %7 : vector<1x96xf32> to vector<2x96xf32>
    %130 = arith.addf %128, %129 : vector<2x96xf32>
    %131 = vector.extract_strided_slice %127 {offsets = [0, 0], sizes = [2, 32], strides = [1, 1]} : vector<2x96xf32> to vector<2x32xf32>
    %132 = vector.extract_strided_slice %130 {offsets = [0, 0], sizes = [2, 32], strides = [1, 1]} : vector<2x96xf32> to vector<2x32xf32>
    %133 = arith.addf %131, %132 : vector<2x32xf32>
    %134 = arith.negf %133 : vector<2x32xf32>
    %135 = math.exp %134 : vector<2x32xf32>
    %cst_41 = arith.constant 1.000000e+00 : f32
    %136 = vector.broadcast %cst_41 : f32 to vector<2x32xf32>
    %137 = arith.addf %136, %135 : vector<2x32xf32>
    %138 = arith.divf %136, %137 : vector<2x32xf32>
    %139 = vector.extract_strided_slice %127 {offsets = [0, 32], sizes = [2, 32], strides = [1, 1]} : vector<2x96xf32> to vector<2x32xf32>
    %140 = vector.extract_strided_slice %130 {offsets = [0, 32], sizes = [2, 32], strides = [1, 1]} : vector<2x96xf32> to vector<2x32xf32>
    %141 = arith.addf %139, %140 : vector<2x32xf32>
    %142 = arith.negf %141 : vector<2x32xf32>
    %143 = math.exp %142 : vector<2x32xf32>
    %cst_42 = arith.constant 1.000000e+00 : f32
    %144 = vector.broadcast %cst_42 : f32 to vector<2x32xf32>
    %145 = arith.addf %144, %143 : vector<2x32xf32>
    %146 = arith.divf %144, %145 : vector<2x32xf32>
    %147 = vector.extract_strided_slice %127 {offsets = [0, 64], sizes = [2, 32], strides = [1, 1]} : vector<2x96xf32> to vector<2x32xf32>
    %148 = vector.extract_strided_slice %130 {offsets = [0, 64], sizes = [2, 32], strides = [1, 1]} : vector<2x96xf32> to vector<2x32xf32>
    %149 = arith.mulf %138, %148 : vector<2x32xf32>
    %150 = arith.addf %147, %149 : vector<2x32xf32>
    %151 = math.tanh %150 : vector<2x32xf32>
    %cst_43 = arith.constant 1.000000e+00 : f32
    %152 = vector.broadcast %cst_43 : f32 to vector<2x32xf32>
    %153 = arith.subf %152, %146 : vector<2x32xf32>
    %154 = arith.mulf %153, %151 : vector<2x32xf32>
    %155 = arith.mulf %146, %100 : vector<2x32xf32>
    %156 = arith.addf %154, %155 : vector<2x32xf32>
    %cst_44 = arith.constant dense<0.000000e+00> : vector<2x14xf32>
    %157 = tpu.matmul %156, %8, %cst_44 {dimension_numbers = #tpu.dot_dimension_numbers<[1], [0], [0], [1], [0, 0, 1, 1], [], []>} : vector<2x32xf32>, vector<32x14xf32>, vector<2x14xf32> -> vector<2x14xf32>
    %158 = vector.broadcast %9 : vector<1x14xf32> to vector<2x14xf32>
    %159 = arith.addf %157, %158 : vector<2x14xf32>
    %cst_45 = arith.constant dense<0xFF800000> : vector<2xf32>
    %160 = vector.multi_reduction <maximumf>, %159, %cst_45 [1] : vector<2x14xf32> to vector<2xf32>
    %161 = vector.shape_cast %160 : vector<2xf32> to vector<2x1xf32>
    %162 = vector.broadcast %161 : vector<2x1xf32> to vector<2x14xf32>
    %163 = arith.subf %159, %162 : vector<2x14xf32>
    %164 = math.exp %163 : vector<2x14xf32>
    %cst_46 = arith.constant dense<0.000000e+00> : vector<2xf32>
    %165 = vector.multi_reduction <add>, %164, %cst_46 [1] : vector<2x14xf32> to vector<2xf32>
    %166 = vector.shape_cast %165 : vector<2xf32> to vector<2x1xf32>
    %167 = math.log %166 : vector<2x1xf32>
    %168 = vector.broadcast %167 : vector<2x1xf32> to vector<2x14xf32>
    %169 = arith.subf %163, %168 : vector<2x14xf32>
    %c2 = arith.constant 2 : index
    %c0_47 = arith.constant 0 : index
    %c0_48 = arith.constant 0 : index
    %170 = vector.load %arg6[%c2, %c0_47, %c0_48] : memref<9x2x14xf32, #tpu.memory_space<vmem>>, vector<1x2x14xf32>
    %171 = vector.shape_cast %170 : vector<1x2x14xf32> to vector<2x14xf32>
    %172 = vector.shape_cast %169 : vector<2x14xf32> to vector<1x2x14xf32>
    tpu.vector_store %arg6[%c2, %c0_47, %c0_48], %172 {strides = array<i32>} : memref<9x2x14xf32, #tpu.memory_space<vmem>>, vector<1x2x14xf32>,
    %cst_49 = arith.constant 0.000000e+00 : f32
    %173 = vector.broadcast %cst_49 : f32 to vector<2x14xf32>
    %174 = arith.cmpf oge, %163, %173 : vector<2x14xf32>
    %c14_i32_50 = arith.constant 14 : i32
    %175 = vector.broadcast %c14_i32_50 : i32 to vector<2x14xi32>
    %176 = arith.select %174, %4, %175 : vector<2x14xi1>, vector<2x14xi32>
    %cst_51 = arith.constant dense<2147483647> : vector<2xi32>
    %177 = vector.multi_reduction <minsi>, %176, %cst_51 [1] : vector<2x14xi32> to vector<2xi32>
    %178 = vector.shape_cast %177 : vector<2xi32> to vector<2x1xi32>
    %179 = vector.broadcast %178 : vector<2x1xi32> to vector<2x14xi32>
    %180 = arith.cmpi eq, %4, %179 : vector<2x14xi32>
    %181 = arith.extui %180 : vector<2x14xi1> to vector<2x14xi32>
    %182 = arith.sitofp %181 : vector<2x14xi32> to vector<2x14xf32>
    %cst_52 = arith.constant dense<0.000000e+00> : vector<2x96xf32>
    %183 = tpu.matmul %182, %5, %cst_52 {dimension_numbers = #tpu.dot_dimension_numbers<[1], [0], [0], [1], [0, 0, 1, 1], [], []>} : vector<2x14xf32>, vector<14x96xf32>, vector<2x96xf32> -> vector<2x96xf32>
    %cst_53 = arith.constant dense<0.000000e+00> : vector<2x96xf32>
    %184 = tpu.matmul %156, %6, %cst_53 {dimension_numbers = #tpu.dot_dimension_numbers<[1], [0], [0], [1], [0, 0, 1, 1], [], []>} : vector<2x32xf32>, vector<32x96xf32>, vector<2x96xf32> -> vector<2x96xf32>
    %185 = vector.broadcast %7 : vector<1x96xf32> to vector<2x96xf32>
    %186 = arith.addf %184, %185 : vector<2x96xf32>
    %187 = vector.extract_strided_slice %183 {offsets = [0, 0], sizes = [2, 32], strides = [1, 1]} : vector<2x96xf32> to vector<2x32xf32>
    %188 = vector.extract_strided_slice %186 {offsets = [0, 0], sizes = [2, 32], strides = [1, 1]} : vector<2x96xf32> to vector<2x32xf32>
    %189 = arith.addf %187, %188 : vector<2x32xf32>
    %190 = arith.negf %189 : vector<2x32xf32>
    %191 = math.exp %190 : vector<2x32xf32>
    %cst_54 = arith.constant 1.000000e+00 : f32
    %192 = vector.broadcast %cst_54 : f32 to vector<2x32xf32>
    %193 = arith.addf %192, %191 : vector<2x32xf32>
    %194 = arith.divf %192, %193 : vector<2x32xf32>
    %195 = vector.extract_strided_slice %183 {offsets = [0, 32], sizes = [2, 32], strides = [1, 1]} : vector<2x96xf32> to vector<2x32xf32>
    %196 = vector.extract_strided_slice %186 {offsets = [0, 32], sizes = [2, 32], strides = [1, 1]} : vector<2x96xf32> to vector<2x32xf32>
    %197 = arith.addf %195, %196 : vector<2x32xf32>
    %198 = arith.negf %197 : vector<2x32xf32>
    %199 = math.exp %198 : vector<2x32xf32>
    %cst_55 = arith.constant 1.000000e+00 : f32
    %200 = vector.broadcast %cst_55 : f32 to vector<2x32xf32>
    %201 = arith.addf %200, %199 : vector<2x32xf32>
    %202 = arith.divf %200, %201 : vector<2x32xf32>
    %203 = vector.extract_strided_slice %183 {offsets = [0, 64], sizes = [2, 32], strides = [1, 1]} : vector<2x96xf32> to vector<2x32xf32>
    %204 = vector.extract_strided_slice %186 {offsets = [0, 64], sizes = [2, 32], strides = [1, 1]} : vector<2x96xf32> to vector<2x32xf32>
    %205 = arith.mulf %194, %204 : vector<2x32xf32>
    %206 = arith.addf %203, %205 : vector<2x32xf32>
    %207 = math.tanh %206 : vector<2x32xf32>
    %cst_56 = arith.constant 1.000000e+00 : f32
    %208 = vector.broadcast %cst_56 : f32 to vector<2x32xf32>
    %209 = arith.subf %208, %202 : vector<2x32xf32>
    %210 = arith.mulf %209, %207 : vector<2x32xf32>
    %211 = arith.mulf %202, %156 : vector<2x32xf32>
    %212 = arith.addf %210, %211 : vector<2x32xf32>
    %cst_57 = arith.constant dense<0.000000e+00> : vector<2x14xf32>
    %213 = tpu.matmul %212, %8, %cst_57 {dimension_numbers = #tpu.dot_dimension_numbers<[1], [0], [0], [1], [0, 0, 1, 1], [], []>} : vector<2x32xf32>, vector<32x14xf32>, vector<2x14xf32> -> vector<2x14xf32>
    %214 = vector.broadcast %9 : vector<1x14xf32> to vector<2x14xf32>
    %215 = arith.addf %213, %214 : vector<2x14xf32>
    %cst_58 = arith.constant dense<0xFF800000> : vector<2xf32>
    %216 = vector.multi_reduction <maximumf>, %215, %cst_58 [1] : vector<2x14xf32> to vector<2xf32>
    %217 = vector.shape_cast %216 : vector<2xf32> to vector<2x1xf32>
    %218 = vector.broadcast %217 : vector<2x1xf32> to vector<2x14xf32>
    %219 = arith.subf %215, %218 : vector<2x14xf32>
    %220 = math.exp %219 : vector<2x14xf32>
    %cst_59 = arith.constant dense<0.000000e+00> : vector<2xf32>
    %221 = vector.multi_reduction <add>, %220, %cst_59 [1] : vector<2x14xf32> to vector<2xf32>
    %222 = vector.shape_cast %221 : vector<2xf32> to vector<2x1xf32>
    %223 = math.log %222 : vector<2x1xf32>
    %224 = vector.broadcast %223 : vector<2x1xf32> to vector<2x14xf32>
    %225 = arith.subf %219, %224 : vector<2x14xf32>
    %c3 = arith.constant 3 : index
    %c0_60 = arith.constant 0 : index
    %c0_61 = arith.constant 0 : index
    %226 = vector.load %arg6[%c3, %c0_60, %c0_61] : memref<9x2x14xf32, #tpu.memory_space<vmem>>, vector<1x2x14xf32>
    %227 = vector.shape_cast %226 : vector<1x2x14xf32> to vector<2x14xf32>
    %228 = vector.shape_cast %225 : vector<2x14xf32> to vector<1x2x14xf32>
    tpu.vector_store %arg6[%c3, %c0_60, %c0_61], %228 {strides = array<i32>} : memref<9x2x14xf32, #tpu.memory_space<vmem>>, vector<1x2x14xf32>,
    %cst_62 = arith.constant 0.000000e+00 : f32
    %229 = vector.broadcast %cst_62 : f32 to vector<2x14xf32>
    %230 = arith.cmpf oge, %219, %229 : vector<2x14xf32>
    %c14_i32_63 = arith.constant 14 : i32
    %231 = vector.broadcast %c14_i32_63 : i32 to vector<2x14xi32>
    %232 = arith.select %230, %4, %231 : vector<2x14xi1>, vector<2x14xi32>
    %cst_64 = arith.constant dense<2147483647> : vector<2xi32>
    %233 = vector.multi_reduction <minsi>, %232, %cst_64 [1] : vector<2x14xi32> to vector<2xi32>
    %234 = vector.shape_cast %233 : vector<2xi32> to vector<2x1xi32>
    %235 = vector.broadcast %234 : vector<2x1xi32> to vector<2x14xi32>
    %236 = arith.cmpi eq, %4, %235 : vector<2x14xi32>
    %237 = arith.extui %236 : vector<2x14xi1> to vector<2x14xi32>
    %238 = arith.sitofp %237 : vector<2x14xi32> to vector<2x14xf32>
    %cst_65 = arith.constant dense<0.000000e+00> : vector<2x96xf32>
    %239 = tpu.matmul %238, %5, %cst_65 {dimension_numbers = #tpu.dot_dimension_numbers<[1], [0], [0], [1], [0, 0, 1, 1], [], []>} : vector<2x14xf32>, vector<14x96xf32>, vector<2x96xf32> -> vector<2x96xf32>
    %cst_66 = arith.constant dense<0.000000e+00> : vector<2x96xf32>
    %240 = tpu.matmul %212, %6, %cst_66 {dimension_numbers = #tpu.dot_dimension_numbers<[1], [0], [0], [1], [0, 0, 1, 1], [], []>} : vector<2x32xf32>, vector<32x96xf32>, vector<2x96xf32> -> vector<2x96xf32>
    %241 = vector.broadcast %7 : vector<1x96xf32> to vector<2x96xf32>
    %242 = arith.addf %240, %241 : vector<2x96xf32>
    %243 = vector.extract_strided_slice %239 {offsets = [0, 0], sizes = [2, 32], strides = [1, 1]} : vector<2x96xf32> to vector<2x32xf32>
    %244 = vector.extract_strided_slice %242 {offsets = [0, 0], sizes = [2, 32], strides = [1, 1]} : vector<2x96xf32> to vector<2x32xf32>
    %245 = arith.addf %243, %244 : vector<2x32xf32>
    %246 = arith.negf %245 : vector<2x32xf32>
    %247 = math.exp %246 : vector<2x32xf32>
    %cst_67 = arith.constant 1.000000e+00 : f32
    %248 = vector.broadcast %cst_67 : f32 to vector<2x32xf32>
    %249 = arith.addf %248, %247 : vector<2x32xf32>
    %250 = arith.divf %248, %249 : vector<2x32xf32>
    %251 = vector.extract_strided_slice %239 {offsets = [0, 32], sizes = [2, 32], strides = [1, 1]} : vector<2x96xf32> to vector<2x32xf32>
    %252 = vector.extract_strided_slice %242 {offsets = [0, 32], sizes = [2, 32], strides = [1, 1]} : vector<2x96xf32> to vector<2x32xf32>
    %253 = arith.addf %251, %252 : vector<2x32xf32>
    %254 = arith.negf %253 : vector<2x32xf32>
    %255 = math.exp %254 : vector<2x32xf32>
    %cst_68 = arith.constant 1.000000e+00 : f32
    %256 = vector.broadcast %cst_68 : f32 to vector<2x32xf32>
    %257 = arith.addf %256, %255 : vector<2x32xf32>
    %258 = arith.divf %256, %257 : vector<2x32xf32>
    %259 = vector.extract_strided_slice %239 {offsets = [0, 64], sizes = [2, 32], strides = [1, 1]} : vector<2x96xf32> to vector<2x32xf32>
    %260 = vector.extract_strided_slice %242 {offsets = [0, 64], sizes = [2, 32], strides = [1, 1]} : vector<2x96xf32> to vector<2x32xf32>
    %261 = arith.mulf %250, %260 : vector<2x32xf32>
    %262 = arith.addf %259, %261 : vector<2x32xf32>
    %263 = math.tanh %262 : vector<2x32xf32>
    %cst_69 = arith.constant 1.000000e+00 : f32
    %264 = vector.broadcast %cst_69 : f32 to vector<2x32xf32>
    %265 = arith.subf %264, %258 : vector<2x32xf32>
    %266 = arith.mulf %265, %263 : vector<2x32xf32>
    %267 = arith.mulf %258, %212 : vector<2x32xf32>
    %268 = arith.addf %266, %267 : vector<2x32xf32>
    %cst_70 = arith.constant dense<0.000000e+00> : vector<2x14xf32>
    %269 = tpu.matmul %268, %8, %cst_70 {dimension_numbers = #tpu.dot_dimension_numbers<[1], [0], [0], [1], [0, 0, 1, 1], [], []>} : vector<2x32xf32>, vector<32x14xf32>, vector<2x14xf32> -> vector<2x14xf32>
    %270 = vector.broadcast %9 : vector<1x14xf32> to vector<2x14xf32>
    %271 = arith.addf %269, %270 : vector<2x14xf32>
    %cst_71 = arith.constant dense<0xFF800000> : vector<2xf32>
    %272 = vector.multi_reduction <maximumf>, %271, %cst_71 [1] : vector<2x14xf32> to vector<2xf32>
    %273 = vector.shape_cast %272 : vector<2xf32> to vector<2x1xf32>
    %274 = vector.broadcast %273 : vector<2x1xf32> to vector<2x14xf32>
    %275 = arith.subf %271, %274 : vector<2x14xf32>
    %276 = math.exp %275 : vector<2x14xf32>
    %cst_72 = arith.constant dense<0.000000e+00> : vector<2xf32>
    %277 = vector.multi_reduction <add>, %276, %cst_72 [1] : vector<2x14xf32> to vector<2xf32>
    %278 = vector.shape_cast %277 : vector<2xf32> to vector<2x1xf32>
    %279 = math.log %278 : vector<2x1xf32>
    %280 = vector.broadcast %279 : vector<2x1xf32> to vector<2x14xf32>
    %281 = arith.subf %275, %280 : vector<2x14xf32>
    %c4 = arith.constant 4 : index
    %c0_73 = arith.constant 0 : index
    %c0_74 = arith.constant 0 : index
    %282 = vector.load %arg6[%c4, %c0_73, %c0_74] : memref<9x2x14xf32, #tpu.memory_space<vmem>>, vector<1x2x14xf32>
    %283 = vector.shape_cast %282 : vector<1x2x14xf32> to vector<2x14xf32>
    %284 = vector.shape_cast %281 : vector<2x14xf32> to vector<1x2x14xf32>
    tpu.vector_store %arg6[%c4, %c0_73, %c0_74], %284 {strides = array<i32>} : memref<9x2x14xf32, #tpu.memory_space<vmem>>, vector<1x2x14xf32>,
    %cst_75 = arith.constant 0.000000e+00 : f32
    %285 = vector.broadcast %cst_75 : f32 to vector<2x14xf32>
    %286 = arith.cmpf oge, %275, %285 : vector<2x14xf32>
    %c14_i32_76 = arith.constant 14 : i32
    %287 = vector.broadcast %c14_i32_76 : i32 to vector<2x14xi32>
    %288 = arith.select %286, %4, %287 : vector<2x14xi1>, vector<2x14xi32>
    %cst_77 = arith.constant dense<2147483647> : vector<2xi32>
    %289 = vector.multi_reduction <minsi>, %288, %cst_77 [1] : vector<2x14xi32> to vector<2xi32>
    %290 = vector.shape_cast %289 : vector<2xi32> to vector<2x1xi32>
    %291 = vector.broadcast %290 : vector<2x1xi32> to vector<2x14xi32>
    %292 = arith.cmpi eq, %4, %291 : vector<2x14xi32>
    %293 = arith.extui %292 : vector<2x14xi1> to vector<2x14xi32>
    %294 = arith.sitofp %293 : vector<2x14xi32> to vector<2x14xf32>
    %cst_78 = arith.constant dense<0.000000e+00> : vector<2x96xf32>
    %295 = tpu.matmul %294, %5, %cst_78 {dimension_numbers = #tpu.dot_dimension_numbers<[1], [0], [0], [1], [0, 0, 1, 1], [], []>} : vector<2x14xf32>, vector<14x96xf32>, vector<2x96xf32> -> vector<2x96xf32>
    %cst_79 = arith.constant dense<0.000000e+00> : vector<2x96xf32>
    %296 = tpu.matmul %268, %6, %cst_79 {dimension_numbers = #tpu.dot_dimension_numbers<[1], [0], [0], [1], [0, 0, 1, 1], [], []>} : vector<2x32xf32>, vector<32x96xf32>, vector<2x96xf32> -> vector<2x96xf32>
    %297 = vector.broadcast %7 : vector<1x96xf32> to vector<2x96xf32>
    %298 = arith.addf %296, %297 : vector<2x96xf32>
    %299 = vector.extract_strided_slice %295 {offsets = [0, 0], sizes = [2, 32], strides = [1, 1]} : vector<2x96xf32> to vector<2x32xf32>
    %300 = vector.extract_strided_slice %298 {offsets = [0, 0], sizes = [2, 32], strides = [1, 1]} : vector<2x96xf32> to vector<2x32xf32>
    %301 = arith.addf %299, %300 : vector<2x32xf32>
    %302 = arith.negf %301 : vector<2x32xf32>
    %303 = math.exp %302 : vector<2x32xf32>
    %cst_80 = arith.constant 1.000000e+00 : f32
    %304 = vector.broadcast %cst_80 : f32 to vector<2x32xf32>
    %305 = arith.addf %304, %303 : vector<2x32xf32>
    %306 = arith.divf %304, %305 : vector<2x32xf32>
    %307 = vector.extract_strided_slice %295 {offsets = [0, 32], sizes = [2, 32], strides = [1, 1]} : vector<2x96xf32> to vector<2x32xf32>
    %308 = vector.extract_strided_slice %298 {offsets = [0, 32], sizes = [2, 32], strides = [1, 1]} : vector<2x96xf32> to vector<2x32xf32>
    %309 = arith.addf %307, %308 : vector<2x32xf32>
    %310 = arith.negf %309 : vector<2x32xf32>
    %311 = math.exp %310 : vector<2x32xf32>
    %cst_81 = arith.constant 1.000000e+00 : f32
    %312 = vector.broadcast %cst_81 : f32 to vector<2x32xf32>
    %313 = arith.addf %312, %311 : vector<2x32xf32>
    %314 = arith.divf %312, %313 : vector<2x32xf32>
    %315 = vector.extract_strided_slice %295 {offsets = [0, 64], sizes = [2, 32], strides = [1, 1]} : vector<2x96xf32> to vector<2x32xf32>
    %316 = vector.extract_strided_slice %298 {offsets = [0, 64], sizes = [2, 32], strides = [1, 1]} : vector<2x96xf32> to vector<2x32xf32>
    %317 = arith.mulf %306, %316 : vector<2x32xf32>
    %318 = arith.addf %315, %317 : vector<2x32xf32>
    %319 = math.tanh %318 : vector<2x32xf32>
    %cst_82 = arith.constant 1.000000e+00 : f32
    %320 = vector.broadcast %cst_82 : f32 to vector<2x32xf32>
    %321 = arith.subf %320, %314 : vector<2x32xf32>
    %322 = arith.mulf %321, %319 : vector<2x32xf32>
    %323 = arith.mulf %314, %268 : vector<2x32xf32>
    %324 = arith.addf %322, %323 : vector<2x32xf32>
    %cst_83 = arith.constant dense<0.000000e+00> : vector<2x14xf32>
    %325 = tpu.matmul %324, %8, %cst_83 {dimension_numbers = #tpu.dot_dimension_numbers<[1], [0], [0], [1], [0, 0, 1, 1], [], []>} : vector<2x32xf32>, vector<32x14xf32>, vector<2x14xf32> -> vector<2x14xf32>
    %326 = vector.broadcast %9 : vector<1x14xf32> to vector<2x14xf32>
    %327 = arith.addf %325, %326 : vector<2x14xf32>
    %cst_84 = arith.constant dense<0xFF800000> : vector<2xf32>
    %328 = vector.multi_reduction <maximumf>, %327, %cst_84 [1] : vector<2x14xf32> to vector<2xf32>
    %329 = vector.shape_cast %328 : vector<2xf32> to vector<2x1xf32>
    %330 = vector.broadcast %329 : vector<2x1xf32> to vector<2x14xf32>
    %331 = arith.subf %327, %330 : vector<2x14xf32>
    %332 = math.exp %331 : vector<2x14xf32>
    %cst_85 = arith.constant dense<0.000000e+00> : vector<2xf32>
    %333 = vector.multi_reduction <add>, %332, %cst_85 [1] : vector<2x14xf32> to vector<2xf32>
    %334 = vector.shape_cast %333 : vector<2xf32> to vector<2x1xf32>
    %335 = math.log %334 : vector<2x1xf32>
    %336 = vector.broadcast %335 : vector<2x1xf32> to vector<2x14xf32>
    %337 = arith.subf %331, %336 : vector<2x14xf32>
    %c5 = arith.constant 5 : index
    %c0_86 = arith.constant 0 : index
    %c0_87 = arith.constant 0 : index
    %338 = vector.load %arg6[%c5, %c0_86, %c0_87] : memref<9x2x14xf32, #tpu.memory_space<vmem>>, vector<1x2x14xf32>
    %339 = vector.shape_cast %338 : vector<1x2x14xf32> to vector<2x14xf32>
    %340 = vector.shape_cast %337 : vector<2x14xf32> to vector<1x2x14xf32>
    tpu.vector_store %arg6[%c5, %c0_86, %c0_87], %340 {strides = array<i32>} : memref<9x2x14xf32, #tpu.memory_space<vmem>>, vector<1x2x14xf32>,
    %cst_88 = arith.constant 0.000000e+00 : f32
    %341 = vector.broadcast %cst_88 : f32 to vector<2x14xf32>
    %342 = arith.cmpf oge, %331, %341 : vector<2x14xf32>
    %c14_i32_89 = arith.constant 14 : i32
    %343 = vector.broadcast %c14_i32_89 : i32 to vector<2x14xi32>
    %344 = arith.select %342, %4, %343 : vector<2x14xi1>, vector<2x14xi32>
    %cst_90 = arith.constant dense<2147483647> : vector<2xi32>
    %345 = vector.multi_reduction <minsi>, %344, %cst_90 [1] : vector<2x14xi32> to vector<2xi32>
    %346 = vector.shape_cast %345 : vector<2xi32> to vector<2x1xi32>
    %347 = vector.broadcast %346 : vector<2x1xi32> to vector<2x14xi32>
    %348 = arith.cmpi eq, %4, %347 : vector<2x14xi32>
    %349 = arith.extui %348 : vector<2x14xi1> to vector<2x14xi32>
    %350 = arith.sitofp %349 : vector<2x14xi32> to vector<2x14xf32>
    %cst_91 = arith.constant dense<0.000000e+00> : vector<2x96xf32>
    %351 = tpu.matmul %350, %5, %cst_91 {dimension_numbers = #tpu.dot_dimension_numbers<[1], [0], [0], [1], [0, 0, 1, 1], [], []>} : vector<2x14xf32>, vector<14x96xf32>, vector<2x96xf32> -> vector<2x96xf32>
    %cst_92 = arith.constant dense<0.000000e+00> : vector<2x96xf32>
    %352 = tpu.matmul %324, %6, %cst_92 {dimension_numbers = #tpu.dot_dimension_numbers<[1], [0], [0], [1], [0, 0, 1, 1], [], []>} : vector<2x32xf32>, vector<32x96xf32>, vector<2x96xf32> -> vector<2x96xf32>
    %353 = vector.broadcast %7 : vector<1x96xf32> to vector<2x96xf32>
    %354 = arith.addf %352, %353 : vector<2x96xf32>
    %355 = vector.extract_strided_slice %351 {offsets = [0, 0], sizes = [2, 32], strides = [1, 1]} : vector<2x96xf32> to vector<2x32xf32>
    %356 = vector.extract_strided_slice %354 {offsets = [0, 0], sizes = [2, 32], strides = [1, 1]} : vector<2x96xf32> to vector<2x32xf32>
    %357 = arith.addf %355, %356 : vector<2x32xf32>
    %358 = arith.negf %357 : vector<2x32xf32>
    %359 = math.exp %358 : vector<2x32xf32>
    %cst_93 = arith.constant 1.000000e+00 : f32
    %360 = vector.broadcast %cst_93 : f32 to vector<2x32xf32>
    %361 = arith.addf %360, %359 : vector<2x32xf32>
    %362 = arith.divf %360, %361 : vector<2x32xf32>
    %363 = vector.extract_strided_slice %351 {offsets = [0, 32], sizes = [2, 32], strides = [1, 1]} : vector<2x96xf32> to vector<2x32xf32>
    %364 = vector.extract_strided_slice %354 {offsets = [0, 32], sizes = [2, 32], strides = [1, 1]} : vector<2x96xf32> to vector<2x32xf32>
    %365 = arith.addf %363, %364 : vector<2x32xf32>
    %366 = arith.negf %365 : vector<2x32xf32>
    %367 = math.exp %366 : vector<2x32xf32>
    %cst_94 = arith.constant 1.000000e+00 : f32
    %368 = vector.broadcast %cst_94 : f32 to vector<2x32xf32>
    %369 = arith.addf %368, %367 : vector<2x32xf32>
    %370 = arith.divf %368, %369 : vector<2x32xf32>
    %371 = vector.extract_strided_slice %351 {offsets = [0, 64], sizes = [2, 32], strides = [1, 1]} : vector<2x96xf32> to vector<2x32xf32>
    %372 = vector.extract_strided_slice %354 {offsets = [0, 64], sizes = [2, 32], strides = [1, 1]} : vector<2x96xf32> to vector<2x32xf32>
    %373 = arith.mulf %362, %372 : vector<2x32xf32>
    %374 = arith.addf %371, %373 : vector<2x32xf32>
    %375 = math.tanh %374 : vector<2x32xf32>
    %cst_95 = arith.constant 1.000000e+00 : f32
    %376 = vector.broadcast %cst_95 : f32 to vector<2x32xf32>
    %377 = arith.subf %376, %370 : vector<2x32xf32>
    %378 = arith.mulf %377, %375 : vector<2x32xf32>
    %379 = arith.mulf %370, %324 : vector<2x32xf32>
    %380 = arith.addf %378, %379 : vector<2x32xf32>
    %cst_96 = arith.constant dense<0.000000e+00> : vector<2x14xf32>
    %381 = tpu.matmul %380, %8, %cst_96 {dimension_numbers = #tpu.dot_dimension_numbers<[1], [0], [0], [1], [0, 0, 1, 1], [], []>} : vector<2x32xf32>, vector<32x14xf32>, vector<2x14xf32> -> vector<2x14xf32>
    %382 = vector.broadcast %9 : vector<1x14xf32> to vector<2x14xf32>
    %383 = arith.addf %381, %382 : vector<2x14xf32>
    %cst_97 = arith.constant dense<0xFF800000> : vector<2xf32>
    %384 = vector.multi_reduction <maximumf>, %383, %cst_97 [1] : vector<2x14xf32> to vector<2xf32>
    %385 = vector.shape_cast %384 : vector<2xf32> to vector<2x1xf32>
    %386 = vector.broadcast %385 : vector<2x1xf32> to vector<2x14xf32>
    %387 = arith.subf %383, %386 : vector<2x14xf32>
    %388 = math.exp %387 : vector<2x14xf32>
    %cst_98 = arith.constant dense<0.000000e+00> : vector<2xf32>
    %389 = vector.multi_reduction <add>, %388, %cst_98 [1] : vector<2x14xf32> to vector<2xf32>
    %390 = vector.shape_cast %389 : vector<2xf32> to vector<2x1xf32>
    %391 = math.log %390 : vector<2x1xf32>
    %392 = vector.broadcast %391 : vector<2x1xf32> to vector<2x14xf32>
    %393 = arith.subf %387, %392 : vector<2x14xf32>
    %c6 = arith.constant 6 : index
    %c0_99 = arith.constant 0 : index
    %c0_100 = arith.constant 0 : index
    %394 = vector.load %arg6[%c6, %c0_99, %c0_100] : memref<9x2x14xf32, #tpu.memory_space<vmem>>, vector<1x2x14xf32>
    %395 = vector.shape_cast %394 : vector<1x2x14xf32> to vector<2x14xf32>
    %396 = vector.shape_cast %393 : vector<2x14xf32> to vector<1x2x14xf32>
    tpu.vector_store %arg6[%c6, %c0_99, %c0_100], %396 {strides = array<i32>} : memref<9x2x14xf32, #tpu.memory_space<vmem>>, vector<1x2x14xf32>,
    %cst_101 = arith.constant 0.000000e+00 : f32
    %397 = vector.broadcast %cst_101 : f32 to vector<2x14xf32>
    %398 = arith.cmpf oge, %387, %397 : vector<2x14xf32>
    %c14_i32_102 = arith.constant 14 : i32
    %399 = vector.broadcast %c14_i32_102 : i32 to vector<2x14xi32>
    %400 = arith.select %398, %4, %399 : vector<2x14xi1>, vector<2x14xi32>
    %cst_103 = arith.constant dense<2147483647> : vector<2xi32>
    %401 = vector.multi_reduction <minsi>, %400, %cst_103 [1] : vector<2x14xi32> to vector<2xi32>
    %402 = vector.shape_cast %401 : vector<2xi32> to vector<2x1xi32>
    %403 = vector.broadcast %402 : vector<2x1xi32> to vector<2x14xi32>
    %404 = arith.cmpi eq, %4, %403 : vector<2x14xi32>
    %405 = arith.extui %404 : vector<2x14xi1> to vector<2x14xi32>
    %406 = arith.sitofp %405 : vector<2x14xi32> to vector<2x14xf32>
    %cst_104 = arith.constant dense<0.000000e+00> : vector<2x96xf32>
    %407 = tpu.matmul %406, %5, %cst_104 {dimension_numbers = #tpu.dot_dimension_numbers<[1], [0], [0], [1], [0, 0, 1, 1], [], []>} : vector<2x14xf32>, vector<14x96xf32>, vector<2x96xf32> -> vector<2x96xf32>
    %cst_105 = arith.constant dense<0.000000e+00> : vector<2x96xf32>
    %408 = tpu.matmul %380, %6, %cst_105 {dimension_numbers = #tpu.dot_dimension_numbers<[1], [0], [0], [1], [0, 0, 1, 1], [], []>} : vector<2x32xf32>, vector<32x96xf32>, vector<2x96xf32> -> vector<2x96xf32>
    %409 = vector.broadcast %7 : vector<1x96xf32> to vector<2x96xf32>
    %410 = arith.addf %408, %409 : vector<2x96xf32>
    %411 = vector.extract_strided_slice %407 {offsets = [0, 0], sizes = [2, 32], strides = [1, 1]} : vector<2x96xf32> to vector<2x32xf32>
    %412 = vector.extract_strided_slice %410 {offsets = [0, 0], sizes = [2, 32], strides = [1, 1]} : vector<2x96xf32> to vector<2x32xf32>
    %413 = arith.addf %411, %412 : vector<2x32xf32>
    %414 = arith.negf %413 : vector<2x32xf32>
    %415 = math.exp %414 : vector<2x32xf32>
    %cst_106 = arith.constant 1.000000e+00 : f32
    %416 = vector.broadcast %cst_106 : f32 to vector<2x32xf32>
    %417 = arith.addf %416, %415 : vector<2x32xf32>
    %418 = arith.divf %416, %417 : vector<2x32xf32>
    %419 = vector.extract_strided_slice %407 {offsets = [0, 32], sizes = [2, 32], strides = [1, 1]} : vector<2x96xf32> to vector<2x32xf32>
    %420 = vector.extract_strided_slice %410 {offsets = [0, 32], sizes = [2, 32], strides = [1, 1]} : vector<2x96xf32> to vector<2x32xf32>
    %421 = arith.addf %419, %420 : vector<2x32xf32>
    %422 = arith.negf %421 : vector<2x32xf32>
    %423 = math.exp %422 : vector<2x32xf32>
    %cst_107 = arith.constant 1.000000e+00 : f32
    %424 = vector.broadcast %cst_107 : f32 to vector<2x32xf32>
    %425 = arith.addf %424, %423 : vector<2x32xf32>
    %426 = arith.divf %424, %425 : vector<2x32xf32>
    %427 = vector.extract_strided_slice %407 {offsets = [0, 64], sizes = [2, 32], strides = [1, 1]} : vector<2x96xf32> to vector<2x32xf32>
    %428 = vector.extract_strided_slice %410 {offsets = [0, 64], sizes = [2, 32], strides = [1, 1]} : vector<2x96xf32> to vector<2x32xf32>
    %429 = arith.mulf %418, %428 : vector<2x32xf32>
    %430 = arith.addf %427, %429 : vector<2x32xf32>
    %431 = math.tanh %430 : vector<2x32xf32>
    %cst_108 = arith.constant 1.000000e+00 : f32
    %432 = vector.broadcast %cst_108 : f32 to vector<2x32xf32>
    %433 = arith.subf %432, %426 : vector<2x32xf32>
    %434 = arith.mulf %433, %431 : vector<2x32xf32>
    %435 = arith.mulf %426, %380 : vector<2x32xf32>
    %436 = arith.addf %434, %435 : vector<2x32xf32>
    %cst_109 = arith.constant dense<0.000000e+00> : vector<2x14xf32>
    %437 = tpu.matmul %436, %8, %cst_109 {dimension_numbers = #tpu.dot_dimension_numbers<[1], [0], [0], [1], [0, 0, 1, 1], [], []>} : vector<2x32xf32>, vector<32x14xf32>, vector<2x14xf32> -> vector<2x14xf32>
    %438 = vector.broadcast %9 : vector<1x14xf32> to vector<2x14xf32>
    %439 = arith.addf %437, %438 : vector<2x14xf32>
    %cst_110 = arith.constant dense<0xFF800000> : vector<2xf32>
    %440 = vector.multi_reduction <maximumf>, %439, %cst_110 [1] : vector<2x14xf32> to vector<2xf32>
    %441 = vector.shape_cast %440 : vector<2xf32> to vector<2x1xf32>
    %442 = vector.broadcast %441 : vector<2x1xf32> to vector<2x14xf32>
    %443 = arith.subf %439, %442 : vector<2x14xf32>
    %444 = math.exp %443 : vector<2x14xf32>
    %cst_111 = arith.constant dense<0.000000e+00> : vector<2xf32>
    %445 = vector.multi_reduction <add>, %444, %cst_111 [1] : vector<2x14xf32> to vector<2xf32>
    %446 = vector.shape_cast %445 : vector<2xf32> to vector<2x1xf32>
    %447 = math.log %446 : vector<2x1xf32>
    %448 = vector.broadcast %447 : vector<2x1xf32> to vector<2x14xf32>
    %449 = arith.subf %443, %448 : vector<2x14xf32>
    %c7 = arith.constant 7 : index
    %c0_112 = arith.constant 0 : index
    %c0_113 = arith.constant 0 : index
    %450 = vector.load %arg6[%c7, %c0_112, %c0_113] : memref<9x2x14xf32, #tpu.memory_space<vmem>>, vector<1x2x14xf32>
    %451 = vector.shape_cast %450 : vector<1x2x14xf32> to vector<2x14xf32>
    %452 = vector.shape_cast %449 : vector<2x14xf32> to vector<1x2x14xf32>
    tpu.vector_store %arg6[%c7, %c0_112, %c0_113], %452 {strides = array<i32>} : memref<9x2x14xf32, #tpu.memory_space<vmem>>, vector<1x2x14xf32>,
    %c0_114 = arith.constant 0 : index
    %c0_115 = arith.constant 0 : index
    %453 = vector.load %arg7[%c0_114, %c0_115] : memref<2x32xf32, #tpu.memory_space<vmem>>, vector<2x32xf32>
    tpu.vector_store %arg7[%c0_114, %c0_115], %436 {strides = array<i32>} : memref<2x32xf32, #tpu.memory_space<vmem>>, vector<2x32xf32>,
    return
  }
}

</mosaic_0001>

<bundles_post_ra>
// kernel: decoder_forward.1
= control target key start
LH: loop header
LB: loop body
LE: loop exit
PB: predicated region body
PF: predicated region fallthrough
CT: control target
= control target key end

     0   :  { %vm51_vm0 = vcmask 1045504   ;;  %v29_v2 = vlaneseq  ;;  %vm27_vm1 = vcmask 107520   ;;  %v1361_v6 = vmov 0.0   ;;  %s1764_s0 = inlined_call_operand.vmem [shape: f32[14,96], index: 0, kind: input, shape index: {}]   ;;  %s1765_s1 = inlined_call_operand.vmem [shape: f32[32,96], index: 1, kind: input, shape index: {}]   ;;  %s1766_s2 = inlined_call_operand.vmem [shape: f32[1,96], index: 2, kind: input, shape index: {}]   ;;  %s1767_s3 = inlined_call_operand.vmem [shape: f32[32,14], index: 3, kind: input, shape index: {}]   ;;  %s1768_s4 = inlined_call_operand.vmem [shape: f32[1,14], index: 4, kind: input, shape index: {}]   ;;  %s1769_s5 = inlined_call_operand.vmem [shape: f32[2,32], index: 5, kind: input, shape index: {}, may-alias: {5,7}]   ;;  %s1770_s6 = inlined_call_operand.hbm [shape: f32[9,2,14], index: 6, kind: output, shape index: {0}]   ;;  %s1771_s7 = inlined_call_operand.vmem [shape: f32[2,32], index: 7, kind: output, shape index: {1}, may-alias: {5,7}]  }
   0x1   :  { %v1410_v0 = vld [vmem:[%s1765_s1 + $0x18] sm:$0xff]  ;;  %v1415_v1 = vld [vmem:[%s1765_s1 + $0x10] sm:$0xff]  ;;  %v1421_v3 = vld [vmem:[%s1764_s0 + $0x8] sm:$0x3f]  ;;  %28 = vst.msk [vmem:[#allocation2 + $0x10] sm:$0x3] %vm27_vm1, %v1361_v6 }
   0x2   :  { %94 = vmatpush.msra.mxu1 %v1410_v0  ;;  %v1426_v4 = vld [vmem:[%s1765_s1 + $0x8] sm:$0xff]  ;;  %1198 = vmatpush.msk.msra.mxu0 %vm51_vm0, %v1421_v3  ;;  %v1433_v5 = vld [vmem:[%s1764_s0] sm:$0xff]  ;;  %v1437_v7 = vand.u32 127, %v29_v2  ;;  %vm47_vm2 = vcmask 113664  }
   0x3   :  { %1204 = vmatpush.msk.msra.mxu3 %vm51_vm0, %v1421_v3  ;;  %v1445_v8 = vld [vmem:[%s1765_s1] sm:$0xff] }
   0x4   :  { %95 = vmatpush.msra.mxu1 %v1415_v1  ;;  %70 = vmatpush.msra.mxu0 %v1433_v5  ;;  %vm44_vm3 = vcmp.eq.s32.totalorder %v1437_v7, 2 }
   0x5   :  { %223 = vmatpush.msra.mxu3 %v1433_v5 }
   0x6   :  { %13 = vsyncpa [#allocation3], 0  ;;  %96 = vmatpush.msra.mxu1 %v1426_v4  ;;  %v43_v9 = vld [vmem:[%s1769_s5] sm:$0x3]  ;;  %vm78_vm4 = vcmask 261120   ;;  %v1197_v10 = vsel %vm44_vm3, 1.0, %v1361_v6  ;;  %240 = vmatpush.msrb.mxu0 %v1410_v0 }
   0x7   :  { %1199 = vmatmul.msk.f32.vlgmr.msra.gmra.mxu0 %vm47_vm2, %v1197_v10  ;;  %v1472_v11 = vld [vmem:[%s1766_s2] ss:$0 sm:$0xff]  ;;  %s1362_s14 = smov 64   ;;  %s1363_s15 = smov 96   ;;  %v1482_v34 = vld [vmem:[%s1767_s3 + $0x18] sm:$0xff]  ;;  %v1487_v35 = vld [vmem:[%s1767_s3 + $0x10] sm:$0xff] }
   0x8   :  { %97 = vmatpush.msra.mxu1 %v1445_v8  ;;  %241 = vmatpush.msrb.mxu0 %v1415_v1  ;;  %s1364_s16 = smov 32   ;;  %v1494_v36 = vld [vmem:[%s1767_s3 + $0x8] sm:$0xff]  ;;  %v1502_v37 = vld [vmem:[%s1767_s3] sm:$0xff]  ;;  %s1181_s10 = sshll.u32 %s1770_s6, 4  ;;  %s1182_s10 = int_to_ptr.hbm [resolvable:$true] %s1181_s10 }
   0x9   :  { %1200 = vmatmul.msk.f32.vlgmr.msra.gmra.mxu1 %vm78_vm4, %v43_v9  ;;  %164 = vmatpush.msra.mxu2 %v1482_v34  ;;  %v1531_v45 = vld [vmem:[%s1768_s4] ss:$0 sm:$0xff]  ;;  %s1366_s11 = smov 2  }
   0xa   :  { %242 = vmatpush.msrb.mxu0 %v1426_v4  ;;  %1210 = vmatpush.msk.msrb.mxu1 %vm51_vm0, %v1421_v3 }
   0xb   :  { %304 = vmatpush.msrb.mxu3 %v1482_v34  ;;  %165 = vmatpush.msra.mxu2 %v1487_v35 }
   0xc   :  { %243 = vmatpush.msrb.mxu0 %v1445_v8  ;;  %364 = vmatpush.msrb.mxu1 %v1433_v5 }
   0xd   :  { %305 = vmatpush.msrb.mxu3 %v1487_v35  ;;  %166 = vmatpush.msra.mxu2 %v1494_v36 }
   0xe   :  { %522 = vmatpush.msra.mxu1 %v1410_v0  ;;  %445 = vmatpush.msra.mxu0 %v1482_v34 }
   0xf   :  { %306 = vmatpush.msrb.mxu3 %v1494_v36  ;;  %167 = vmatpush.msra.mxu2 %v1502_v37 }
  0x10   :  { %523 = vmatpush.msra.mxu1 %v1415_v1  ;;  %446 = vmatpush.msra.mxu0 %v1487_v35 }
  0x11   :  { %307 = vmatpush.msrb.mxu3 %v1502_v37  ;;  %381 = vmatpush.msrb.mxu2 %v1410_v0 }
  0x12   :  { %524 = vmatpush.msra.mxu1 %v1426_v4  ;;  %447 = vmatpush.msra.mxu0 %v1494_v36 }
  0x13   :  { %382 = vmatpush.msrb.mxu2 %v1415_v1 }
  0x14   :  { %525 = vmatpush.msra.mxu1 %v1445_v8  ;;  %448 = vmatpush.msra.mxu0 %v1502_v37 }
  0x15   :  { %383 = vmatpush.msrb.mxu2 %v1426_v4 }
  0x17   :  { %384 = vmatpush.msrb.mxu2 %v1445_v8 }
  0x84   :  { %v72_v14 = vpop.f32.mrf.mxu0 }
  0x86   :  { %v99_v12 = vpop.f32.mrf.mxu1 }
  0x87   :  { %v100_v13 = vadd.f32 %v1472_v11, %v99_v12 }
  0x89   :  { %123 = vrot.lane.b32.xlu0 %v100_v13, %s1362_s14  ;;  %v102_v15 = vadd.f32 %v100_v13, %v72_v14 }
  0x8b   :  { %v1201_v16 = vmul.f32 -1.442695, %v102_v15 }
  0x8d   :  { %1253 = vpow2.f32 %v1201_v16 }
  0x93   :  { %v1254_v17 = vpop.eup %1253 }
  0x94   :  { %v106_v18 = vadd.f32 1.0, %v1254_v17 }
  0x96   :  { %1255 = vrcp.f32 %v106_v18  ;;  %v118_v24 = vand.u32 2147483648, %v106_v18  ;;  %vm112_vm6 = vweird.f32 %v106_v18  ;;  %v116_v25 = vand.u32 2147483647, %v106_v18 }
  0x98   :  { %v119_v27 = vor.u32 1.1754944e-38, %v118_v24  ;;  %vm117_vm8 = vcmp.eq.f32.partialorder %v116_v25, 8.507059e+37 }
  0x9c   :  { %v1256_v19 = vpop.eup %1255 }
  0x9d   :  { %v108_v20 = vmul.f32 %v1256_v19, %v106_v18  ;;  %vm113_vm5 = vweird.f32 %v1256_v19 }
  0x9e   :  { %vm114_vm7 = vmor %vm112_vm6, %vm113_vm5 }
  0x9f   :  { %v109_v21 = vsub.f32 1.0, %v108_v20 }
  0xa1   :  { %v110_v22 = vmul.f32 %v1256_v19, %v109_v21 }
  0xa3   :  { %v111_v23 = vadd.f32 %v1256_v19, %v110_v22 }
  0xa5   :  { %v115_v26 = vsel %vm114_vm7, %v1256_v19, %v111_v23 }
  0xa6   :  { %v120_v29 = vsel %vm117_vm8, %v119_v27, %v115_v26 }
  0xa7   :  { %v133_v39 = vsub.f32 1.0, %v120_v29 }
  0xfb   :  { %v124_v28 = vpop.permute.xlu0 %123 }
  0xfc   :  { %v126_v30 = vmul.f32 %v124_v28, %v120_v29 }
  0xfe   :  { %128 = vrot.lane.b32.xlu0 %v126_v30, %s1362_s14 }
 0x170   :  { %v129_v31 = vpop.permute.xlu0 %128 }
 0x171   :  { %v131_v32 = vadd.f32 %v129_v31, %v72_v14 }
 0x173   :  { %1257 = vtanh.f32 %v131_v32 }
 0x179   :  { %v1258_v33 = vpop.eup %1257 }
 0x17a   :  { %135 = vrot.lane.b32.xlu1 %v1258_v33, %s1363_s15 }
 0x182   :  { %139 = vrot.lane.b32.xlu1 %v43_v9, %s1364_s16 }
 0x1ec   :  { %v136_v38 = vpop.permute.xlu1 %135 }
 0x1ed   :  { %v138_v41 = vmul.f32 %v136_v38, %v133_v39 }
 0x1f4   :  { %v140_v40 = vpop.permute.xlu1 %139 }
 0x1f5   :  { %v142_v42 = vmul.f32 %v140_v40, %v120_v29 }
 0x1f7   :  { %v1515_v43 = vadd.f32 %v142_v42, %v138_v41 }
 0x1f9   :  { %148 = vrot.lane.b32.xlu2 %v1515_v43, %s1363_s15 }
 0x253   :  { %v149_v44 = vpop.permute.xlu2 %148 }
 0x254   :  { %1202 = vmatmul.msk.f32.vlgmr.msra.gmra.mxu2 %vm78_vm4, %v149_v44  ;;  %1206 = vmatmul.msk.f32.vlgmr.msrb.gmra.mxu0 %vm78_vm4, %v149_v44 }
 0x255   :  { %586 = vmatpush.msra.mxu2 %v1482_v34  ;;  %1222 = vmatpush.msk.msrb.mxu0 %vm51_vm0, %v1421_v3 }
 0x257   :  { %587 = vmatpush.msra.mxu2 %v1487_v35  ;;  %646 = vmatpush.msrb.mxu0 %v1433_v5 }
 0x259   :  { %588 = vmatpush.msra.mxu2 %v1494_v36 }
 0x25b   :  { %589 = vmatpush.msra.mxu2 %v1502_v37 }
 0x2d1   :  { %v245_v49 = vpop.f32.mrf.mxu0 }
 0x2d2   :  { %v246_v50 = vadd.f32 %v1472_v11, %v245_v49 }
 0x2d7   :  { %v169_v46 = vpop.f32.mrf.mxu2 }
 0x2d8   :  { %v170_v47 = vadd.f32 %v1531_v45, %v169_v46 }
 0x2da   :  { %v172_v48 = vsel %vm27_vm1, %v170_v47, -inf }
 0x2db   :  { %173 = vmax.xlane.f32.xlu2 %v172_v48 }
 0x2f3   :  { %269 = vrot.lane.b32.xlu2 %v246_v50, %s1362_s14 }
 0x34e   :  { %v174_v51 = vpop.xlane.xlu2 %173 }
 0x34f   :  { %v1537_v52 = vsub.f32 %v170_v47, %v174_v51 }
 0x351   :  { %vm185_vm9 = vcmp.ge.f32.partialorder %v1537_v52, 0.0 }
 0x352   :  { %v186_v53 = vsel %vm185_vm9, %v1437_v7, 14 }
 0x353   :  { %v187_v54 = vsel %vm27_vm1, %v186_v53, 2147483647 }
 0x354   :  { %v189_v55 = vshra.s32 %v187_v54, 16  ;;  %v188_v57 = vand.u32 65535, %v187_v54 }
 0x356   :  { %v191_v56 = vcvt.s32.f32 %v189_v55  ;;  %v190_v59 = vcvt.s32.f32 %v188_v57  ;;  %v270_v26 = vpop.permute.xlu2 %269 }
 0x358   :  { %192 = vmin.xlane.f32.xlu0 %v191_v56 }
 0x3cb   :  { %v193_v58 = vpop.xlane.xlu0 %192 }
 0x3cc   :  { %vm194_vm10 = vcmp.eq.f32.partialorder %v191_v56, %v193_v58  ;;  %v199_v61 = vcvt.f32.s32 %v193_v58 }
 0x3cd   :  { %v195_v60 = vsel %vm194_vm10, %v190_v59, inf }
 0x3ce   :  { %196 = vmin.xlane.f32.xlu1 %v195_v60  ;;  %v200_v63 = vshll.u32 %v199_v61, 16 }
 0x441   :  { %v197_v62 = vpop.xlane.xlu1 %196 }
 0x442   :  { %v198_v2 = vcvt.f32.s32 %v197_v62 }
 0x444   :  { %v201_v9 = vadd.s32 %v200_v63, %v198_v2 }
 0x446   :  { %vm202_vm11 = vcmp.eq.s32.totalorder %v1437_v7, %v201_v9 }
 0x447   :  { %v1203_v10 = vsel %vm202_vm11, 1.0, %v1361_v6 }
 0x448   :  { %1205 = vmatmul.msk.f32.vlgmr.msra.gmra.mxu3 %vm47_vm2, %v1203_v10 }
 0x449   :  { %1216 = vmatpush.msk.msra.mxu3 %vm51_vm0, %v1421_v3 }
 0x44b   :  { %505 = vmatpush.msra.mxu3 %v1433_v5 }
 0x4cb   :  { %v225_v12 = vpop.f32.mrf.mxu3 }
 0x4cc   :  { %v248_v13 = vadd.f32 %v246_v50, %v225_v12 }
 0x4ce   :  { %v1207_v14 = vmul.f32 -1.442695, %v248_v13 }
 0x4d0   :  { %1259 = vpow2.f32 %v1207_v14 }
 0x4d6   :  { %v1260_v15 = vpop.eup %1259 }
 0x4d7   :  { %v252_v16 = vadd.f32 1.0, %v1260_v15 }
 0x4d9   :  { %1261 = vrcp.f32 %v252_v16  ;;  %v264_v20 = vand.u32 2147483648, %v252_v16  ;;  %v262_v22 = vand.u32 2147483647, %v252_v16  ;;  %vm258_vm13 = vweird.f32 %v252_v16 }
 0x4db   :  { %v265_v24 = vor.u32 1.1754944e-38, %v264_v20  ;;  %vm263_vm15 = vcmp.eq.f32.partialorder %v262_v22, 8.507059e+37 }
 0x4df   :  { %v1262_v17 = vpop.eup %1261 }
 0x4e0   :  { %v254_v18 = vmul.f32 %v1262_v17, %v252_v16  ;;  %vm259_vm12 = vweird.f32 %v1262_v17 }
 0x4e1   :  { %vm260_vm14 = vmor %vm258_vm13, %vm259_vm12 }
 0x4e2   :  { %v255_v19 = vsub.f32 1.0, %v254_v18 }
 0x4e4   :  { %v256_v21 = vmul.f32 %v1262_v17, %v255_v19 }
 0x4e6   :  { %v257_v23 = vadd.f32 %v1262_v17, %v256_v21 }
 0x4e8   :  { %v261_v25 = vsel %vm260_vm14, %v1262_v17, %v257_v23 }
 0x4e9   :  { %v266_v27 = vsel %vm263_vm15, %v265_v24, %v261_v25 }
 0x4ea   :  { %v272_v28 = vmul.f32 %v270_v26, %v266_v27  ;;  %v279_v32 = vsub.f32 1.0, %v266_v27  ;;  %v285_v38 = vmul.f32 %v266_v27, %v1515_v43 }
 0x4ec   :  { %274 = vrot.lane.b32.xlu0 %v272_v28, %s1362_s14 }
 0x55e   :  { %v275_v29 = vpop.permute.xlu0 %274 }
 0x55f   :  { %v277_v30 = vadd.f32 %v275_v29, %v225_v12 }
 0x561   :  { %1263 = vtanh.f32 %v277_v30 }
 0x567   :  { %v1264_v31 = vpop.eup %1263 }
 0x568   :  { %281 = vrot.lane.b32.xlu1 %v1264_v31, %s1363_s15 }
 0x5da   :  { %v282_v33 = vpop.permute.xlu1 %281 }
 0x5db   :  { %v284_v39 = vmul.f32 %v282_v33, %v279_v32 }
 0x5dd   :  { %v1551_v40 = vadd.f32 %v285_v38, %v284_v39 }
 0x5df   :  { %288 = vrot.lane.b32.xlu2 %v1551_v40, %s1363_s15 }
 0x639   :  { %v289_v41 = vpop.permute.xlu2 %288 }
 0x63a   :  { %1208 = vmatmul.msk.f32.vlgmr.msrb.gmra.mxu3 %vm78_vm4, %v289_v41  ;;  %1212 = vmatmul.msk.f32.vlgmr.msrb.gmra.mxu2 %vm78_vm4, %v289_v41 }
 0x63b   :  { %663 = vmatpush.msrb.mxu3 %v1410_v0  ;;  %1228 = vmatpush.msk.msrb.mxu2 %vm51_vm0, %v1421_v3 }
 0x63d   :  { %664 = vmatpush.msrb.mxu3 %v1415_v1  ;;  %787 = vmatpush.msrb.mxu2 %v1433_v5 }
 0x63f   :  { %665 = vmatpush.msrb.mxu3 %v1426_v4 }
 0x641   :  { %666 = vmatpush.msrb.mxu3 %v1445_v8 }
 0x6bd   :  { %v309_v42 = vpop.f32.mrf.mxu3  ;;  %v386_v46 = vpop.f32.mrf.mxu2 }
 0x6be   :  { %v310_v43 = vadd.f32 %v1531_v45, %v309_v42  ;;  %v387_v47 = vadd.f32 %v1472_v11, %v386_v46 }
 0x6c0   :  { %v312_v44 = vsel %vm27_vm1, %v310_v43, -inf }
 0x6c1   :  { %313 = vmax.xlane.f32.xlu0 %v312_v44 }
 0x6d5   :  { %410 = vrot.lane.b32.xlu0 %v387_v47, %s1362_s14 }
 0x734   :  { %v314_v48 = vpop.xlane.xlu0 %313 }
 0x735   :  { %v1568_v49 = vsub.f32 %v310_v43, %v314_v48 }
 0x737   :  { %vm326_vm3 = vcmp.ge.f32.partialorder %v1568_v49, 0.0 }
 0x738   :  { %v327_v50 = vsel %vm326_vm3, %v1437_v7, 14 }
 0x739   :  { %v328_v51 = vsel %vm27_vm1, %v327_v50, 2147483647 }
 0x73a   :  { %v330_v53 = vshra.s32 %v328_v51, 16  ;;  %v329_v55 = vand.u32 65535, %v328_v51 }
 0x73c   :  { %v332_v54 = vcvt.s32.f32 %v330_v53  ;;  %v331_v57 = vcvt.s32.f32 %v329_v55 }
 0x73e   :  { %333 = vmin.xlane.f32.xlu2 %v332_v54 }
 0x747   :  { %v411_v24 = vpop.permute.xlu0 %410 }
 0x7b1   :  { %v334_v56 = vpop.xlane.xlu2 %333 }
 0x7b2   :  { %vm335_vm5 = vcmp.eq.f32.partialorder %v332_v54, %v334_v56  ;;  %v340_v59 = vcvt.f32.s32 %v334_v56 }
 0x7b3   :  { %v336_v58 = vsel %vm335_vm5, %v331_v57, inf }
 0x7b4   :  { %337 = vmin.xlane.f32.xlu1 %v336_v58  ;;  %v341_v61 = vshll.u32 %v340_v59, 16 }
 0x827   :  { %v338_v60 = vpop.xlane.xlu1 %337 }
 0x828   :  { %v339_v62 = vcvt.f32.s32 %v338_v60 }
 0x82a   :  { %v342_v63 = vadd.s32 %v341_v61, %v339_v62 }
 0x82c   :  { %vm343_vm6 = vcmp.eq.s32.totalorder %v1437_v7, %v342_v63 }
 0x82d   :  { %v1209_v2 = vsel %vm343_vm6, 1.0, %v1361_v6 }
 0x82e   :  { %1211 = vmatmul.msk.f32.vlgmr.msrb.gmra.mxu1 %vm47_vm2, %v1209_v2 }
 0x82f   :  { %727 = vmatpush.msrb.mxu1 %v1482_v34 }
 0x831   :  { %728 = vmatpush.msrb.mxu1 %v1487_v35 }
 0x833   :  { %729 = vmatpush.msrb.mxu1 %v1494_v36 }
 0x835   :  { %730 = vmatpush.msrb.mxu1 %v1502_v37 }
 0x8ab   :  { %v366_v9 = vpop.f32.mrf.mxu1 }
 0x8ac   :  { %v389_v10 = vadd.f32 %v387_v47, %v366_v9 }
 0x8ae   :  { %v1213_v12 = vmul.f32 -1.442695, %v389_v10 }
 0x8b0   :  { %1265 = vpow2.f32 %v1213_v12 }
 0x8b6   :  { %v1266_v13 = vpop.eup %1265 }
 0x8b7   :  { %v393_v14 = vadd.f32 1.0, %v1266_v13 }
 0x8b9   :  { %1267 = vrcp.f32 %v393_v14  ;;  %v405_v18 = vand.u32 2147483648, %v393_v14  ;;  %v403_v20 = vand.u32 2147483647, %v393_v14  ;;  %vm399_vm8 = vweird.f32 %v393_v14 }
 0x8bb   :  { %v406_v22 = vor.u32 1.1754944e-38, %v405_v18  ;;  %vm404_vm10 = vcmp.eq.f32.partialorder %v403_v20, 8.507059e+37 }
 0x8bf   :  { %v1268_v15 = vpop.eup %1267 }
 0x8c0   :  { %v395_v16 = vmul.f32 %v1268_v15, %v393_v14  ;;  %vm400_vm7 = vweird.f32 %v1268_v15 }
 0x8c1   :  { %vm401_vm9 = vmor %vm399_vm8, %vm400_vm7 }
 0x8c2   :  { %v396_v17 = vsub.f32 1.0, %v395_v16 }
 0x8c4   :  { %v397_v19 = vmul.f32 %v1268_v15, %v396_v17 }
 0x8c6   :  { %v398_v21 = vadd.f32 %v1268_v15, %v397_v19 }
 0x8c8   :  { %v402_v23 = vsel %vm401_vm9, %v1268_v15, %v398_v21 }
 0x8c9   :  { %v407_v25 = vsel %vm404_vm10, %v406_v22, %v402_v23 }
 0x8ca   :  { %v413_v26 = vmul.f32 %v411_v24, %v407_v25  ;;  %v420_v30 = vsub.f32 1.0, %v407_v25  ;;  %v426_v32 = vmul.f32 %v407_v25, %v1551_v40 }
 0x8cc   :  { %415 = vrot.lane.b32.xlu2 %v413_v26, %s1362_s14 }
 0x926   :  { %v416_v27 = vpop.permute.xlu2 %415 }
 0x927   :  { %v418_v28 = vadd.f32 %v416_v27, %v366_v9 }
 0x929   :  { %1269 = vtanh.f32 %v418_v28 }
 0x92f   :  { %v1270_v29 = vpop.eup %1269 }
 0x930   :  { %422 = vrot.lane.b32.xlu1 %v1270_v29, %s1363_s15 }
 0x9a2   :  { %v423_v31 = vpop.permute.xlu1 %422 }
 0x9a3   :  { %v425_v33 = vmul.f32 %v423_v31, %v420_v30 }
 0x9a5   :  { %v1583_v38 = vadd.f32 %v426_v32, %v425_v33 }
 0x9a7   :  { %429 = vrot.lane.b32.xlu0 %v1583_v38, %s1363_s15 }
 0xa19   :  { %v430_v39 = vpop.permute.xlu0 %429 }
 0xa1a   :  { %1214 = vmatmul.msk.f32.vlgmr.msra.gmra.mxu0 %vm78_vm4, %v430_v39  ;;  %1218 = vmatmul.msk.f32.vlgmr.msra.gmra.mxu1 %vm78_vm4, %v430_v39 }
 0xa1b   :  { %804 = vmatpush.msra.mxu0 %v1410_v0  ;;  %1234 = vmatpush.msk.msra.mxu1 %vm51_vm0, %v1421_v3 }
 0xa1d   :  { %805 = vmatpush.msra.mxu0 %v1415_v1  ;;  %928 = vmatpush.msra.mxu1 %v1433_v5 }
 0xa1f   :  { %806 = vmatpush.msra.mxu0 %v1426_v4 }
 0xa21   :  { %807 = vmatpush.msra.mxu0 %v1445_v8 }
 0xa97   :  { %v450_v40 = vpop.f32.mrf.mxu0  ;;  %v527_v43 = vpop.f32.mrf.mxu1 }
 0xa98   :  { %v451_v41 = vadd.f32 %v1531_v45, %v450_v40  ;;  %v528_v44 = vadd.f32 %v1472_v11, %v527_v43 }
 0xa9a   :  { %v453_v42 = vsel %vm27_vm1, %v451_v41, -inf }
 0xa9b   :  { %454 = vmax.xlane.f32.xlu2 %v453_v42 }
 0xab3   :  { %551 = vrot.lane.b32.xlu2 %v528_v44, %s1362_s14 }
 0xb0e   :  { %v455_v46 = vpop.xlane.xlu2 %454 }
 0xb0f   :  { %v1600_v47 = vsub.f32 %v451_v41, %v455_v46 }
 0xb11   :  { %vm467_vm11 = vcmp.ge.f32.partialorder %v1600_v47, 0.0 }
 0xb12   :  { %v468_v48 = vsel %vm467_vm11, %v1437_v7, 14 }
 0xb13   :  { %v469_v50 = vsel %vm27_vm1, %v468_v48, 2147483647 }
 0xb14   :  { %v471_v51 = vshra.s32 %v469_v50, 16  ;;  %v470_v54 = vand.u32 65535, %v469_v50 }
 0xb16   :  { %v473_v53 = vcvt.s32.f32 %v471_v51  ;;  %v472_v56 = vcvt.s32.f32 %v470_v54  ;;  %v552_v23 = vpop.permute.xlu2 %551 }
 0xb18   :  { %474 = vmin.xlane.f32.xlu0 %v473_v53 }
 0xb8b   :  { %v475_v55 = vpop.xlane.xlu0 %474 }
 0xb8c   :  { %vm476_vm12 = vcmp.eq.f32.partialorder %v473_v53, %v475_v55  ;;  %v481_v58 = vcvt.f32.s32 %v475_v55 }
 0xb8d   :  { %v477_v57 = vsel %vm476_vm12, %v472_v56, inf }
 0xb8e   :  { %478 = vmin.xlane.f32.xlu1 %v477_v57  ;;  %v482_v60 = vshll.u32 %v481_v58, 16 }
 0xc01   :  { %v479_v59 = vpop.xlane.xlu1 %478 }
 0xc02   :  { %v480_v61 = vcvt.f32.s32 %v479_v59 }
 0xc04   :  { %v483_v62 = vadd.s32 %v482_v60, %v480_v61 }
 0xc06   :  { %vm484_vm13 = vcmp.eq.s32.totalorder %v1437_v7, %v483_v62 }
 0xc07   :  { %v1215_v63 = vsel %vm484_vm13, 1.0, %v1361_v6 }
 0xc08   :  { %1217 = vmatmul.msk.f32.vlgmr.msra.gmra.mxu3 %vm47_vm2, %v1215_v63 }
 0xc09   :  { %868 = vmatpush.msra.mxu3 %v1482_v34 }
 0xc0b   :  { %869 = vmatpush.msra.mxu3 %v1487_v35 }
 0xc0d   :  { %870 = vmatpush.msra.mxu3 %v1494_v36 }
 0xc0f   :  { %871 = vmatpush.msra.mxu3 %v1502_v37 }
 0xc8b   :  { %v507_v2 = vpop.f32.mrf.mxu3 }
 0xc8c   :  { %v530_v9 = vadd.f32 %v528_v44, %v507_v2 }
 0xc8e   :  { %v1219_v10 = vmul.f32 -1.442695, %v530_v9 }
 0xc90   :  { %1271 = vpow2.f32 %v1219_v10 }
 0xc96   :  { %v1272_v12 = vpop.eup %1271 }
 0xc97   :  { %v534_v13 = vadd.f32 1.0, %v1272_v12 }
 0xc99   :  { %1273 = vrcp.f32 %v534_v13  ;;  %v546_v17 = vand.u32 2147483648, %v534_v13  ;;  %v544_v19 = vand.u32 2147483647, %v534_v13  ;;  %vm540_vm15 = vweird.f32 %v534_v13 }
 0xc9b   :  { %v547_v21 = vor.u32 1.1754944e-38, %v546_v17  ;;  %vm545_vm5 = vcmp.eq.f32.partialorder %v544_v19, 8.507059e+37 }
 0xc9f   :  { %v1274_v14 = vpop.eup %1273 }
 0xca0   :  { %v536_v15 = vmul.f32 %v1274_v14, %v534_v13  ;;  %vm541_vm14 = vweird.f32 %v1274_v14 }
 0xca1   :  { %vm542_vm3 = vmor %vm540_vm15, %vm541_vm14 }
 0xca2   :  { %v537_v16 = vsub.f32 1.0, %v536_v15 }
 0xca4   :  { %v538_v18 = vmul.f32 %v1274_v14, %v537_v16 }
 0xca6   :  { %v539_v20 = vadd.f32 %v1274_v14, %v538_v18 }
 0xca8   :  { %v543_v22 = vsel %vm542_vm3, %v1274_v14, %v539_v20 }
 0xca9   :  { %v548_v24 = vsel %vm545_vm5, %v547_v21, %v543_v22 }
 0xcaa   :  { %v554_v25 = vmul.f32 %v552_v23, %v548_v24  ;;  %v561_v29 = vsub.f32 1.0, %v548_v24  ;;  %v567_v31 = vmul.f32 %v548_v24, %v1583_v38 }
 0xcac   :  { %556 = vrot.lane.b32.xlu0 %v554_v25, %s1362_s14 }
 0xd1e   :  { %v557_v26 = vpop.permute.xlu0 %556 }
 0xd1f   :  { %v559_v27 = vadd.f32 %v557_v26, %v507_v2 }
 0xd21   :  { %1275 = vtanh.f32 %v559_v27 }
 0xd27   :  { %v1276_v28 = vpop.eup %1275 }
 0xd28   :  { %563 = vrot.lane.b32.xlu1 %v1276_v28, %s1363_s15 }
 0xd9a   :  { %v564_v30 = vpop.permute.xlu1 %563 }
 0xd9b   :  { %v566_v32 = vmul.f32 %v564_v30, %v561_v29 }
 0xd9d   :  { %v1615_v33 = vadd.f32 %v567_v31, %v566_v32 }
 0xd9f   :  { %570 = vrot.lane.b32.xlu0 %v1615_v33, %s1363_s15 }
 0xe11   :  { %v571_v39 = vpop.permute.xlu0 %570 }
 0xe12   :  { %1220 = vmatmul.msk.f32.vlgmr.msra.gmra.mxu2 %vm78_vm4, %v571_v39  ;;  %1224 = vmatmul.msk.f32.vlgmr.msrb.gmra.mxu3 %vm78_vm4, %v571_v39 }
 0xe13   :  { %945 = vmatpush.msra.mxu2 %v1410_v0  ;;  %1240 = vmatpush.msk.msrb.mxu3 %vm51_vm0, %v1421_v3 }
 0xe15   :  { %946 = vmatpush.msra.mxu2 %v1415_v1  ;;  %1069 = vmatpush.msrb.mxu3 %v1433_v5 }
 0xe17   :  { %947 = vmatpush.msra.mxu2 %v1426_v4 }
 0xe19   :  { %948 = vmatpush.msra.mxu2 %v1445_v8 }
 0xe95   :  { %v591_v38 = vpop.f32.mrf.mxu2  ;;  %v668_v42 = vpop.f32.mrf.mxu3 }
 0xe96   :  { %v592_v40 = vadd.f32 %v1531_v45, %v591_v38  ;;  %v669_v43 = vadd.f32 %v1472_v11, %v668_v42 }
 0xe98   :  { %v594_v41 = vsel %vm27_vm1, %v592_v40, -inf }
 0xe99   :  { %595 = vmax.xlane.f32.xlu2 %v594_v41 }
 0xeb1   :  { %692 = vrot.lane.b32.xlu2 %v669_v43, %s1362_s14 }
 0xf0c   :  { %v596_v3 = vpop.xlane.xlu2 %595 }
 0xf0d   :  { %v1632_v44 = vsub.f32 %v592_v40, %v596_v3 }
 0xf0f   :  { %vm608_vm0 = vcmp.ge.f32.partialorder %v1632_v44, 0.0 }
 0xf10   :  { %v609_v5 = vsel %vm608_vm0, %v1437_v7, 14 }
 0xf11   :  { %v610_v46 = vsel %vm27_vm1, %v609_v5, 2147483647 }
 0xf12   :  { %v612_v48 = vshra.s32 %v610_v46, 16  ;;  %v611_v51 = vand.u32 65535, %v610_v46 }
 0xf14   :  { %v614_v50 = vcvt.s32.f32 %v612_v48  ;;  %v613_v54 = vcvt.s32.f32 %v611_v51  ;;  %v693_v21 = vpop.permute.xlu2 %692 }
 0xf16   :  { %615 = vmin.xlane.f32.xlu1 %v614_v50 }
 0xf89   :  { %v616_v53 = vpop.xlane.xlu1 %615 }
 0xf8a   :  { %vm617_vm6 = vcmp.eq.f32.partialorder %v614_v50, %v616_v53  ;;  %v622_v56 = vcvt.f32.s32 %v616_v53 }
 0xf8b   :  { %v618_v55 = vsel %vm617_vm6, %v613_v54, inf }
 0xf8c   :  { %619 = vmin.xlane.f32.xlu0 %v618_v55  ;;  %v623_v58 = vshll.u32 %v622_v56, 16 }
 0xfff   :  { %v620_v57 = vpop.xlane.xlu0 %619 }
0x1000   :  { %v621_v59 = vcvt.f32.s32 %v620_v57 }
0x1002   :  { %v624_v60 = vadd.s32 %v623_v58, %v621_v59 }
0x1004   :  { %vm625_vm7 = vcmp.eq.s32.totalorder %v1437_v7, %v624_v60 }
0x1005   :  { %v1221_v61 = vsel %vm625_vm7, 1.0, %v1361_v6 }
0x1006   :  { %1223 = vmatmul.msk.f32.vlgmr.msrb.gmra.mxu0 %vm47_vm2, %v1221_v61 }
0x1007   :  { %1009 = vmatpush.msrb.mxu0 %v1482_v34 }
0x1009   :  { %1010 = vmatpush.msrb.mxu0 %v1487_v35 }
0x100b   :  { %1011 = vmatpush.msrb.mxu0 %v1494_v36 }
0x100d   :  { %1012 = vmatpush.msrb.mxu0 %v1502_v37 }
0x1083   :  { %v648_v62 = vpop.f32.mrf.mxu0 }
0x1084   :  { %v671_v63 = vadd.f32 %v669_v43, %v648_v62 }
0x1086   :  { %v1225_v2 = vmul.f32 -1.442695, %v671_v63 }
0x1088   :  { %1277 = vpow2.f32 %v1225_v2 }
0x108e   :  { %v1278_v9 = vpop.eup %1277 }
0x108f   :  { %v675_v10 = vadd.f32 1.0, %v1278_v9 }
0x1091   :  { %1279 = vrcp.f32 %v675_v10  ;;  %v687_v15 = vand.u32 2147483648, %v675_v10  ;;  %v685_v17 = vand.u32 2147483647, %v675_v10  ;;  %vm681_vm9 = vweird.f32 %v675_v10 }
0x1093   :  { %v688_v19 = vor.u32 1.1754944e-38, %v687_v15  ;;  %vm686_vm11 = vcmp.eq.f32.partialorder %v685_v17, 8.507059e+37 }
0x1097   :  { %v1280_v12 = vpop.eup %1279 }
0x1098   :  { %v677_v13 = vmul.f32 %v1280_v12, %v675_v10  ;;  %vm682_vm8 = vweird.f32 %v1280_v12 }
0x1099   :  { %vm683_vm10 = vmor %vm681_vm9, %vm682_vm8 }
0x109a   :  { %v678_v14 = vsub.f32 1.0, %v677_v13 }
0x109c   :  { %v679_v16 = vmul.f32 %v1280_v12, %v678_v14 }
0x109e   :  { %v680_v18 = vadd.f32 %v1280_v12, %v679_v16 }
0x10a0   :  { %v684_v20 = vsel %vm683_vm10, %v1280_v12, %v680_v18 }
0x10a1   :  { %v689_v22 = vsel %vm686_vm11, %v688_v19, %v684_v20 }
0x10a2   :  { %v695_v23 = vmul.f32 %v693_v21, %v689_v22  ;;  %v702_v27 = vsub.f32 1.0, %v689_v22  ;;  %v708_v29 = vmul.f32 %v689_v22, %v1615_v33 }
0x10a4   :  { %697 = vrot.lane.b32.xlu1 %v695_v23, %s1362_s14 }
0x1116   :  { %v698_v24 = vpop.permute.xlu1 %697 }
0x1117   :  { %v700_v25 = vadd.f32 %v698_v24, %v648_v62 }
0x1119   :  { %1281 = vtanh.f32 %v700_v25 }
0x111f   :  { %v1282_v26 = vpop.eup %1281 }
0x1120   :  { %704 = vrot.lane.b32.xlu0 %v1282_v26, %s1363_s15 }
0x1192   :  { %v705_v28 = vpop.permute.xlu0 %704 }
0x1193   :  { %v707_v30 = vmul.f32 %v705_v28, %v702_v27 }
0x1195   :  { %v1647_v31 = vadd.f32 %v708_v29, %v707_v30 }
0x1197   :  { %711 = vrot.lane.b32.xlu2 %v1647_v31, %s1363_s15 }
0x11f1   :  { %v712_v32 = vpop.permute.xlu2 %711 }
0x11f2   :  { %1226 = vmatmul.msk.f32.vlgmr.msrb.gmra.mxu1 %vm78_vm4, %v712_v32  ;;  %1230 = vmatmul.msk.f32.vlgmr.msra.gmra.mxu0 %vm78_vm4, %v712_v32 }
0x11f3   :  { %1086 = vmatpush.msrb.mxu1 %v1410_v0 }
0x11f5   :  { %1087 = vmatpush.msrb.mxu1 %v1415_v1 }
0x11f7   :  { %1088 = vmatpush.msrb.mxu1 %v1426_v4 }
0x11f9   :  { %1089 = vmatpush.msrb.mxu1 %v1445_v8 }
0x126f   :  { %v732_v33 = vpop.f32.mrf.mxu1  ;;  %v809_v40 = vpop.f32.mrf.mxu0 }
0x1270   :  { %v733_v39 = vadd.f32 %v1531_v45, %v732_v33  ;;  %v810_v41 = vadd.f32 %v1472_v11, %v809_v40 }
0x1272   :  { %v735_v38 = vsel %vm27_vm1, %v733_v39, -inf }
0x1273   :  { %736 = vmax.xlane.f32.xlu0 %v735_v38 }
0x1287   :  { %833 = vrot.lane.b32.xlu0 %v810_v41, %s1362_s14 }
0x12e6   :  { %v737_v42 = vpop.xlane.xlu0 %736 }
0x12e7   :  { %v1661_v43 = vsub.f32 %v733_v39, %v737_v42 }
0x12e9   :  { %vm749_vm12 = vcmp.ge.f32.partialorder %v1661_v43, 0.0 }
0x12ea   :  { %v750_v0 = vsel %vm749_vm12, %v1437_v7, 14 }
0x12eb   :  { %v751_v1 = vsel %vm27_vm1, %v750_v0, 2147483647 }
0x12ec   :  { %v753_v4 = vshra.s32 %v751_v1, 16  ;;  %v752_v3 = vand.u32 65535, %v751_v1 }
0x12ee   :  { %v755_v8 = vcvt.s32.f32 %v753_v4  ;;  %v754_v46 = vcvt.s32.f32 %v752_v3 }
0x12f0   :  { %756 = vmin.xlane.f32.xlu1 %v755_v8 }
0x1363   :  { %v757_v5 = vpop.xlane.xlu1 %756 }
0x1364   :  { %vm758_vm13 = vcmp.eq.f32.partialorder %v755_v8, %v757_v5  ;;  %v763_v50 = vcvt.f32.s32 %v757_v5 }
0x1365   :  { %v759_v48 = vsel %vm758_vm13, %v754_v46, inf }
0x1366   :  { %760 = vmin.xlane.f32.xlu2 %v759_v48  ;;  %v764_v53 = vshll.u32 %v763_v50, 16 }
0x13d9   :  { %v761_v51 = vpop.xlane.xlu2 %760 }
0x13da   :  { %v762_v54 = vcvt.f32.s32 %v761_v51 }
0x13dc   :  { %v765_v55 = vadd.s32 %v764_v53, %v762_v54 }
0x13de   :  { %vm766_vm14 = vcmp.eq.s32.totalorder %v1437_v7, %v765_v55 }
0x13df   :  { %v1227_v56 = vsel %vm766_vm14, 1.0, %v1361_v6 }
0x13e0   :  { %1229 = vmatmul.msk.f32.vlgmr.msrb.gmra.mxu2 %vm47_vm2, %v1227_v56 }
0x13e1   :  { %1150 = vmatpush.msrb.mxu2 %v1482_v34 }
0x13e3   :  { %1151 = vmatpush.msrb.mxu2 %v1487_v35 }
0x13e5   :  { %1152 = vmatpush.msrb.mxu2 %v1494_v36 }
0x13e7   :  { %1153 = vmatpush.msrb.mxu2 %v1502_v37  ;;  %v834_v37 = vpop.permute.xlu0 %833 }
0x1463   :  { %v789_v57 = vpop.f32.mrf.mxu2 }
0x1464   :  { %v812_v58 = vadd.f32 %v810_v41, %v789_v57 }
0x1466   :  { %v1231_v59 = vmul.f32 -1.442695, %v812_v58 }
0x1468   :  { %1283 = vpow2.f32 %v1231_v59 }
0x146e   :  { %v1284_v60 = vpop.eup %1283 }
0x146f   :  { %v816_v61 = vadd.f32 1.0, %v1284_v60 }
0x1471   :  { %1285 = vrcp.f32 %v816_v61  ;;  %v828_v9 = vand.u32 2147483648, %v816_v61  ;;  %v826_v34 = vand.u32 2147483647, %v816_v61  ;;  %vm822_vm3 = vweird.f32 %v816_v61 }
0x1473   :  { %v829_v35 = vor.u32 1.1754944e-38, %v828_v9  ;;  %vm827_vm0 = vcmp.eq.f32.partialorder %v826_v34, 8.507059e+37 }
0x1477   :  { %v1286_v62 = vpop.eup %1285 }
0x1478   :  { %v818_v63 = vmul.f32 %v1286_v62, %v816_v61  ;;  %vm823_vm15 = vweird.f32 %v1286_v62 }
0x1479   :  { %vm824_vm5 = vmor %vm822_vm3, %vm823_vm15 }
0x147a   :  { %v819_v2 = vsub.f32 1.0, %v818_v63 }
0x147c   :  { %v820_v10 = vmul.f32 %v1286_v62, %v819_v2 }
0x147e   :  { %v821_v12 = vadd.f32 %v1286_v62, %v820_v10 }
0x1480   :  { %v825_v36 = vsel %vm824_vm5, %v1286_v62, %v821_v12 }
0x1481   :  { %v830_v13 = vsel %vm827_vm0, %v829_v35, %v825_v36 }
0x1482   :  { %v836_v14 = vmul.f32 %v834_v37, %v830_v13  ;;  %v843_v18 = vsub.f32 1.0, %v830_v13  ;;  %v849_v20 = vmul.f32 %v830_v13, %v1647_v31 }
0x1484   :  { %838 = vrot.lane.b32.xlu2 %v836_v14, %s1362_s14 }
0x14de   :  { %v839_v15 = vpop.permute.xlu2 %838 }
0x14df   :  { %v841_v16 = vadd.f32 %v839_v15, %v789_v57 }
0x14e1   :  { %1287 = vtanh.f32 %v841_v16 }
0x14e7   :  { %v1288_v17 = vpop.eup %1287 }
0x14e8   :  { %845 = vrot.lane.b32.xlu1 %v1288_v17, %s1363_s15 }
0x155a   :  { %v846_v19 = vpop.permute.xlu1 %845 }
0x155b   :  { %v848_v21 = vmul.f32 %v846_v19, %v843_v18  ;;  %v1333_v19 = vld [vmem:[%s1766_s2] ss:$0 sm:$0xff] }
0x155d   :  { %v1676_v22 = vadd.f32 %v849_v20, %v848_v21 }
0x155f   :  { %852 = vrot.lane.b32.xlu0 %v1676_v22, %s1363_s15 }
0x15d1   :  { %v853_v23 = vpop.permute.xlu0 %852 }
0x15d2   :  { %1232 = vmatmul.msk.f32.vlgmr.msra.gmra.mxu3 %vm78_vm4, %v853_v23  ;;  %1236 = vmatmul.msk.f32.vlgmr.msra.gmra.mxu2 %vm78_vm4, %v853_v23 }
0x1655   :  { %v873_v24 = vpop.f32.mrf.mxu3  ;;  %v950_v27 = vpop.f32.mrf.mxu2 }
0x1656   :  { %v874_v25 = vadd.f32 %v1531_v45, %v873_v24  ;;  %v951_v28 = vadd.f32 %v1472_v11, %v950_v27 }
0x1658   :  { %v876_v26 = vsel %vm27_vm1, %v874_v25, -inf }
0x1659   :  { %877 = vmax.xlane.f32.xlu2 %v876_v26 }
0x1671   :  { %974 = vrot.lane.b32.xlu2 %v951_v28, %s1362_s14 }
0x16cc   :  { %v878_v29 = vpop.xlane.xlu2 %877 }
0x16cd   :  { %v1686_v30 = vsub.f32 %v874_v25, %v878_v29 }
0x16cf   :  { %vm890_vm6 = vcmp.ge.f32.partialorder %v1686_v30, 0.0 }
0x16d0   :  { %v891_v31 = vsel %vm890_vm6, %v1437_v7, 14  ;;  %vm1173_vm6 = vcmask 254976  }
0x16d1   :  { %v892_v32 = vsel %vm27_vm1, %v891_v31, 2147483647 }
0x16d2   :  { %v894_v33 = vshra.s32 %v892_v32, 16  ;;  %v893_v38 = vand.u32 65535, %v892_v32 }
0x16d4   :  { %v896_v39 = vcvt.s32.f32 %v894_v33  ;;  %v895_v41 = vcvt.s32.f32 %v893_v38  ;;  %v975_v62 = vpop.permute.xlu2 %974 }
0x16d6   :  { %897 = vmin.xlane.f32.xlu0 %v896_v39 }
0x1749   :  { %v898_v40 = vpop.xlane.xlu0 %897 }
0x174a   :  { %vm899_vm7 = vcmp.eq.f32.partialorder %v896_v39, %v898_v40  ;;  %v904_v11 = vcvt.f32.s32 %v898_v40 }
0x174b   :  { %v900_v42 = vsel %vm899_vm7, %v895_v41, inf }
0x174c   :  { %901 = vmin.xlane.f32.xlu1 %v900_v42  ;;  %v905_v1 = vshll.u32 %v904_v11, 16 }
0x17bf   :  { %v902_v0 = vpop.xlane.xlu1 %901 }
0x17c0   :  { %v903_v4 = vcvt.f32.s32 %v902_v0 }
0x17c2   :  { %v906_v8 = vadd.s32 %v905_v1, %v903_v4 }
0x17c4   :  { %vm907_vm8 = vcmp.eq.s32.totalorder %v1437_v7, %v906_v8 }
0x17c5   :  { %v1233_v3 = vsel %vm907_vm8, 1.0, %v1361_v6 }
0x17c6   :  { %1235 = vmatmul.msk.f32.vlgmr.msra.gmra.mxu1 %vm47_vm2, %v1233_v3 }
0x1843   :  { %v930_v5 = vpop.f32.mrf.mxu1 }
0x1844   :  { %v953_v46 = vadd.f32 %v951_v28, %v930_v5 }
0x1846   :  { %v1237_v48 = vmul.f32 -1.442695, %v953_v46 }
0x1848   :  { %1289 = vpow2.f32 %v1237_v48 }
0x184e   :  { %v1290_v50 = vpop.eup %1289 }
0x184f   :  { %v957_v51 = vadd.f32 1.0, %v1290_v50 }
0x1851   :  { %1291 = vrcp.f32 %v957_v51  ;;  %v969_v56 = vand.u32 2147483648, %v957_v51  ;;  %v967_v58 = vand.u32 2147483647, %v957_v51  ;;  %vm963_vm10 = vweird.f32 %v957_v51 }
0x1853   :  { %v970_v60 = vor.u32 1.1754944e-38, %v969_v56  ;;  %vm968_vm12 = vcmp.eq.f32.partialorder %v967_v58, 8.507059e+37  ;;  %v598_v56 = vmul.f32 1.442695, %v1632_v44 }
0x1857   :  { %v1292_v53 = vpop.eup %1291 }
0x1858   :  { %v959_v54 = vmul.f32 %v1292_v53, %v957_v51  ;;  %vm964_vm9 = vweird.f32 %v1292_v53 }
0x1859   :  { %vm965_vm11 = vmor %vm963_vm10, %vm964_vm9 }
0x185a   :  { %v960_v55 = vsub.f32 1.0, %v959_v54 }
0x185c   :  { %v961_v57 = vmul.f32 %v1292_v53, %v960_v55  ;;  %v176_v55 = vmul.f32 1.442695, %v1537_v52 }
0x185e   :  { %v962_v59 = vadd.f32 %v1292_v53, %v961_v57 }
0x1860   :  { %v966_v61 = vsel %vm965_vm11, %v1292_v53, %v962_v59 }
0x1861   :  { %v971_v63 = vsel %vm968_vm12, %v970_v60, %v966_v61 }
0x1862   :  { %v977_v2 = vmul.f32 %v975_v62, %v971_v63  ;;  %v984_v12 = vsub.f32 1.0, %v971_v63  ;;  %v990_v36 = vmul.f32 %v971_v63, %v1676_v22 }
0x1864   :  { %979 = vrot.lane.b32.xlu0 %v977_v2, %s1362_s14 }
0x18d6   :  { %v980_v9 = vpop.permute.xlu0 %979 }
0x18d7   :  { %v982_v10 = vadd.f32 %v980_v9, %v930_v5 }
0x18d9   :  { %1293 = vtanh.f32 %v982_v10 }
0x18df   :  { %v1294_v34 = vpop.eup %1293 }
0x18e0   :  { %986 = vrot.lane.b32.xlu1 %v1294_v34, %s1363_s15 }
0x1952   :  { %v987_v35 = vpop.permute.xlu1 %986 }
0x1953   :  { %v989_v37 = vmul.f32 %v987_v35, %v984_v12 }
0x1955   :  { %v1697_v13 = vadd.f32 %v990_v36, %v989_v37 }
0x1957   :  { %993 = vrot.lane.b32.xlu0 %v1697_v13, %s1363_s15 }
0x19c9   :  { %v994_v14 = vpop.permute.xlu0 %993 }
0x19ca   :  { %1238 = vmatmul.msk.f32.vlgmr.msrb.gmra.mxu0 %vm78_vm4, %v994_v14  ;;  %1242 = vmatmul.msk.f32.vlgmr.msrb.gmra.mxu1 %vm78_vm4, %v994_v14 }
0x1a47   :  { %v1014_v15 = vpop.f32.mrf.mxu0  ;;  %v1091_v18 = vpop.f32.mrf.mxu1 }
0x1a48   :  { %v1015_v16 = vadd.f32 %v1531_v45, %v1014_v15  ;;  %v1092_v20 = vadd.f32 %v1333_v19, %v1091_v18 }
0x1a4a   :  { %v1017_v17 = vsel %vm27_vm1, %v1015_v16, -inf }
0x1a4b   :  { %1018 = vmax.xlane.f32.xlu2 %v1017_v17 }
0x1a63   :  { %1115 = vrot.lane.b32.xlu2 %v1092_v20, %s1362_s14 }
0x1abe   :  { %v1019_v21 = vpop.xlane.xlu2 %1018 }
0x1abf   :  { %v1709_v22 = vsub.f32 %v1015_v16, %v1019_v21 }
0x1ac1   :  { %vm1031_vm13 = vcmp.ge.f32.partialorder %v1709_v22, 0.0  ;;  %v1021_v59 = vmul.f32 1.442695, %v1709_v22 }
0x1ac2   :  { %v1032_v23 = vsel %vm1031_vm13, %v1437_v7, 14 }
0x1ac3   :  { %v1033_v45 = vsel %vm27_vm1, %v1032_v23, 2147483647 }
0x1ac4   :  { %v1035_v24 = vshra.s32 %v1033_v45, 16  ;;  %v1034_v26 = vand.u32 65535, %v1033_v45 }
0x1ac6   :  { %v1037_v25 = vcvt.s32.f32 %v1035_v24  ;;  %v1036_v28 = vcvt.s32.f32 %v1034_v26  ;;  %v1116_v51 = vpop.permute.xlu2 %1115 }
0x1ac8   :  { %1038 = vmin.xlane.f32.xlu1 %v1037_v25 }
0x1b3b   :  { %v1039_v27 = vpop.xlane.xlu1 %1038 }
0x1b3c   :  { %vm1040_vm14 = vcmp.eq.f32.partialorder %v1037_v25, %v1039_v27  ;;  %v1045_v31 = vcvt.f32.s32 %v1039_v27  ;;  %v316_v25 = vmul.f32 1.442695, %v1568_v49 }
0x1b3d   :  { %v1041_v29 = vsel %vm1040_vm14, %v1036_v28, inf }
0x1b3e   :  { %1042 = vmin.xlane.f32.xlu0 %v1041_v29  ;;  %v1046_v33 = vshll.u32 %v1045_v31, 16 }
0x1bb1   :  { %v1043_v32 = vpop.xlane.xlu0 %1042 }
0x1bb2   :  { %v1044_v39 = vcvt.f32.s32 %v1043_v32 }
0x1bb4   :  { %v1047_v38 = vadd.s32 %v1046_v33, %v1044_v39 }
0x1bb6   :  { %vm1048_vm15 = vcmp.eq.s32.totalorder %v1437_v7, %v1047_v38 }
0x1bb7   :  { %v1239_v40 = vsel %vm1048_vm15, 1.0, %v1361_v6 }
0x1bb8   :  { %1241 = vmatmul.msk.f32.vlgmr.msrb.gmra.mxu3 %vm47_vm2, %v1239_v40 }
0x1c3b   :  { %v1071_v41 = vpop.f32.mrf.mxu3 }
0x1c3c   :  { %v1094_v42 = vadd.f32 %v1092_v20, %v1071_v41 }
0x1c3e   :  { %v1243_v11 = vmul.f32 -1.442695, %v1094_v42  ;;  %v457_v42 = vmul.f32 1.442695, %v1600_v47 }
0x1c40   :  { %1295 = vpow2.f32 %v1243_v11 }
0x1c46   :  { %v1296_v0 = vpop.eup %1295 }
0x1c47   :  { %v1098_v1 = vadd.f32 1.0, %v1296_v0  ;;  %v1334_v0 = vld [vmem:[%s1768_s4] ss:$0 sm:$0xff]  ;;  %s1365_s4 = smov [#allocation2]  }
0x1c48   :  { %s1179_s30 = sshll.u32 %s1365_s4, 4  ;;  %s1180_s30 = int_to_ptr.vmem [resolvable:$true] %s1179_s30 }
0x1c49   :  { %1297 = vrcp.f32 %v1098_v1  ;;  %v1110_v5 = vand.u32 2147483648, %v1098_v1  ;;  %v1108_v48 = vand.u32 2147483647, %v1098_v1  ;;  %vm1104_vm5 = vweird.f32 %v1098_v1 }
0x1c4a   :  { %1299 = vpow2.f32 %v176_v55 }
0x1c4b   :  { %v1111_v6 = vor.u32 1.1754944e-38, %v1110_v5  ;;  %vm1109_vm2 = vcmp.eq.f32.partialorder %v1108_v48, 8.507059e+37  ;;  %1301 = vpow2.f32 %v598_v56 }
0x1c4c   :  { %1303 = vpow2.f32 %v1021_v59 }
0x1c4f   :  { %v1298_v4 = vpop.eup %1297 }
0x1c50   :  { %v1100_v8 = vmul.f32 %v1298_v4, %v1098_v1  ;;  %vm1105_vm3 = vweird.f32 %v1298_v4  ;;  %v1300_v57 = vpop.eup %1299 }
0x1c51   :  { %vm1106_vm0 = vmor %vm1104_vm5, %vm1105_vm3  ;;  %v178_v58 = vsel %vm27_vm1, %v1300_v57, 0.0  ;;  %v1302_v60 = vpop.eup %1301 }
0x1c52   :  { %v1101_v3 = vsub.f32 1.0, %v1100_v8  ;;  %v600_v61 = vsel %vm27_vm1, %v1302_v60, 0.0  ;;  %v1304_v62 = vpop.eup %1303 }
0x1c53   :  { %v1023_v63 = vsel %vm27_vm1, %v1304_v62, 0.0 }
0x1c54   :  { %v1102_v46 = vmul.f32 %v1298_v4, %v1101_v3 }
0x1c56   :  { %v1103_v50 = vadd.f32 %v1298_v4, %v1102_v46 }
0x1c58   :  { %v1107_v7 = vsel %vm1106_vm0, %v1298_v4, %v1103_v50 }
0x1c59   :  { %v1112_v53 = vsel %vm1109_vm2, %v1111_v6, %v1107_v7 }
0x1c5a   :  { %v1118_v54 = vmul.f32 %v1116_v51, %v1112_v53  ;;  %v1125_v21 = vsub.f32 1.0, %v1112_v53 }
0x1c5c   :  { %1120 = vrot.lane.b32.xlu1 %v1118_v54, %s1362_s14 }
0x1c86   :  { %179 = vadd.xlane.f32.xlu1 %v178_v58 }
0x1c8e   :  { %601 = vadd.xlane.f32.xlu1 %v600_v61 }
0x1c96   :  { %1024 = vadd.xlane.f32.xlu1 %v1023_v63 }
0x1cce   :  { %v1121_v2 = vpop.permute.xlu1 %1120 }
0x1ccf   :  { %v1123_v9 = vadd.f32 %v1121_v2, %v1071_v41 }
0x1cd1   :  { %1305 = vtanh.f32 %v1123_v9 }
0x1cd7   :  { %v1306_v10 = vpop.eup %1305 }
0x1cd8   :  { %1127 = vrot.lane.b32.xlu0 %v1306_v10, %s1363_s15 }
0x1cf9   :  { %v180_v34 = vpop.xlane.xlu1 %179 }
0x1cfa   :  { %1307 = vlog2.f32 %v180_v34 }
0x1d00   :  { %v1308_v12 = vpop.eup %1307 }
0x1d01   :  { %v182_v35 = vmul.f32 0.6931472, %v1308_v12  ;;  %v602_v36 = vpop.xlane.xlu1 %601 }
0x1d02   :  { %1309 = vlog2.f32 %v602_v36 }
0x1d03   :  { %v183_v37 = vsub.f32 %v1537_v52, %v182_v35  ;;  %v1131_v52 = vmul.f32 %v1112_v53, %v1697_v13 }
0x1d05   :  { %184 = vst.msk [vmem:[#allocation2] sm:$0x3] %vm27_vm1, %v183_v37 }
0x1d08   :  { %v1310_v14 = vpop.eup %1309 }
0x1d09   :  { %v604_v15 = vmul.f32 0.6931472, %v1310_v14  ;;  %v1025_v16 = vpop.xlane.xlu1 %1024 }
0x1d0a   :  { %1311 = vlog2.f32 %v1025_v16 }
0x1d0b   :  { %v605_v17 = vsub.f32 %v1632_v44, %v604_v15  ;;  %1313 = vpow2.f32 %v316_v25  ;;  %v739_v44 = vmul.f32 1.442695, %v1661_v43 }
0x1d0d   :  { %607 = vst.msk [vmem:[#allocation2 + $0x6] sm:$0x3] %vm27_vm1, %v605_v17  ;;  %1315 = vpow2.f32 %v739_v44 }
0x1d10   :  { %v1312_v18 = vpop.eup %1311 }
0x1d11   :  { %v1027_v19 = vmul.f32 0.6931472, %v1312_v18  ;;  %v1314_v26 = vpop.eup %1313 }
0x1d12   :  { %v318_v27 = vsel %vm27_vm1, %v1314_v26, 0.0 }
0x1d13   :  { %v1028_v20 = vsub.f32 %v1709_v22, %v1027_v19  ;;  %v1316_v22 = vpop.eup %1315 }
0x1d14   :  { %v741_v28 = vsel %vm27_vm1, %v1316_v22, 0.0 }
0x1d15   :  { %1030 = vst.msk [vmem:[#allocation2 + $0xc] sm:$0x3] %vm27_vm1, %v1028_v20 }
0x1d4a   :  { %v1128_v23 = vpop.permute.xlu0 %1127 }
0x1d4b   :  { %v1130_v45 = vmul.f32 %v1128_v23, %v1125_v21 }
0x1d4d   :  { %v1132_v24 = vadd.f32 %v1131_v52, %v1130_v45 }
0x1d4f   :  { %1134 = vrot.lane.b32.xlu2 %v1132_v24, %s1363_s15 }
0x1d78   :  { %319 = vadd.xlane.f32.xlu2 %v318_v27 }
0x1d80   :  { %742 = vadd.xlane.f32.xlu2 %v741_v28 }
0x1da9   :  { %v1135_v13 = vpop.permute.xlu2 %1134 }
0x1daa   :  { %1174 = vst.msk [vmem:[%s1771_s7] sm:$0x3] %vm1173_vm6, %v1135_v13  ;;  %1244 = vmatmul.msk.f32.vlgmr.msrb.gmra.mxu2 %vm78_vm4, %v1135_v13 }
0x1deb   :  { %v320_v29 = vpop.xlane.xlu2 %319 }
0x1dec   :  { %1317 = vlog2.f32 %v320_v29 }
0x1df2   :  { %v1318_v31 = vpop.eup %1317 }
0x1df3   :  { %v322_v32 = vmul.f32 0.6931472, %v1318_v31  ;;  %v743_v33 = vpop.xlane.xlu2 %742 }
0x1df4   :  { %1319 = vlog2.f32 %v743_v33 }
0x1df5   :  { %v323_v39 = vsub.f32 %v1568_v49, %v322_v32  ;;  %1321 = vpow2.f32 %v457_v42  ;;  %v880_v49 = vmul.f32 1.442695, %v1686_v30 }
0x1df7   :  { %325 = vst.msk [vmem:[#allocation2 + $0x2] sm:$0x3] %vm27_vm1, %v323_v39  ;;  %1323 = vpow2.f32 %v880_v49 }
0x1dfa   :  { %v1320_v38 = vpop.eup %1319 }
0x1dfb   :  { %v745_v40 = vmul.f32 0.6931472, %v1320_v38  ;;  %v1322_v8 = vpop.eup %1321 }
0x1dfd   :  { %v746_v41 = vsub.f32 %v1661_v43, %v745_v40  ;;  %v459_v43 = vsel %vm27_vm1, %v1322_v8, 0.0  ;;  %v1324_v3 = vpop.eup %1323 }
0x1dfe   :  { %v882_v5 = vsel %vm27_vm1, %v1324_v3, 0.0 }
0x1dff   :  { %748 = vst.msk [vmem:[#allocation2 + $0x8] sm:$0x3] %vm27_vm1, %v746_v41 }
0x1e2d   :  { %v1155_v11 = vpop.f32.mrf.mxu2 }
0x1e2e   :  { %v1156_v1 = vadd.f32 %v1334_v0, %v1155_v11 }
0x1e30   :  { %v1158_v4 = vsel %vm27_vm1, %v1156_v1, -inf }
0x1e31   :  { %1159 = vmax.xlane.f32.xlu0 %v1158_v4 }
0x1e39   :  { %460 = vadd.xlane.f32.xlu0 %v459_v43 }
0x1e41   :  { %883 = vadd.xlane.f32.xlu0 %v882_v5 }
0x1ea4   :  { %v1160_v46 = vpop.xlane.xlu0 %1159 }
0x1ea5   :  { %v1161_v48 = vsub.f32 %v1156_v1, %v1160_v46 }
0x1ea7   :  { %v1162_v50 = vmul.f32 1.442695, %v1161_v48 }
0x1ea9   :  { %1325 = vpow2.f32 %v1162_v50 }
0x1eac   :  { %v461_v6 = vpop.xlane.xlu0 %460 }
0x1ead   :  { %1327 = vlog2.f32 %v461_v6 }
0x1eaf   :  { %v1326_v7 = vpop.eup %1325 }
0x1eb0   :  { %v1164_v51 = vsel %vm27_vm1, %v1326_v7, 0.0 }
0x1eb1   :  { %1165 = vadd.xlane.f32.xlu2 %v1164_v51 }
0x1eb3   :  { %v1328_v53 = vpop.eup %1327 }
0x1eb4   :  { %v463_v54 = vmul.f32 0.6931472, %v1328_v53  ;;  %v884_v55 = vpop.xlane.xlu0 %883 }
0x1eb5   :  { %1329 = vlog2.f32 %v884_v55 }
0x1eb6   :  { %v464_v56 = vsub.f32 %v1600_v47, %v463_v54 }
0x1eb8   :  { %466 = vst.msk [vmem:[#allocation2 + $0x4] sm:$0x3] %vm27_vm1, %v464_v56 }
0x1ebb   :  { %v1330_v57 = vpop.eup %1329 }
0x1ebc   :  { %v886_v58 = vmul.f32 0.6931472, %v1330_v57 }
0x1ebe   :  { %v887_v59 = vsub.f32 %v1686_v30, %v886_v58 }
0x1ec0   :  { %889 = vst.msk [vmem:[#allocation2 + $0xa] sm:$0x3] %vm27_vm1, %v887_v59 }
0x1f24   :  { %v1166_v60 = vpop.xlane.xlu2 %1165 }
0x1f25   :  { %1331 = vlog2.f32 %v1166_v60 }
0x1f2b   :  { %v1332_v61 = vpop.eup %1331 }
0x1f2c   :  { %v1168_v62 = vmul.f32 0.6931472, %v1332_v61 }
0x1f2e   :  { %v1169_v47 = vsub.f32 %v1161_v48, %v1168_v62 }
0x1f30   :  { %1171 = vst.msk [vmem:[#allocation2 + $0xe] sm:$0x3] %vm27_vm1, %v1169_v47 }
0x1f31   :  { %1187 = dma.vmem_to_hbm [thread:$0]  %s1180_s30, 288, %s1182_s10, [#allocation3], %s1364_s16, %s1364_s16, %s1366_s11  }
0x1f32   :  { %1359 = dma.done.wait [#allocation3], 288  }
0x1f33   :  { %1360 = vsyncadd [#allocation3], 4294967008 }
0x1f34   :  { %1196 = vsyncpa [#allocation3], 1 }

</bundles_post_ra>
